<compile_context>
chip_gen: v6e
topology: v6e:2x2x1
jax: 0.10.0
libtpu: 0.0.40
codegen_flags: <defaults>
</compile_context>

<pallas_src>
import functools

import jax
import jax.numpy as jnp
from jax.experimental import pallas as pl
from jax.experimental.pallas import tpu as pltpu


def _round_up(x, m):
    return ((x + m - 1) // m) * m


def _pick_time_block(T, bb, g4, budget_bytes=8 * 1024 * 1024):
    """Largest divisor of T whose (TB, BB, 4Hp) f32 slab (double buffered) fits."""
    tb = T
    while tb > 1:
        if T % tb == 0 and 2 * tb * bb * g4 * 4 <= budget_bytes:
            return tb
        tb -= 1
    return 1


def lstm_kernel(gx_ref, whh_ref, h_out_ref, h_scr, c_scr):
    """Recurrent part only.  Grid = (batch_blocks [parallel], time_blocks [arbitrary]).

    gx_ref : (TB, BB, 4Hp)  precomputed x@W_ih^T + bias, padded/lane-aligned
    whh_ref: (Hp, 4Hp)      padded W_hh^T (resident across all grid steps)
    h_out_ref: (BB, Hp)     last hidden state (written on final time block)
    h_scr/c_scr: (BB, Hp)   state carried across time blocks in VMEM
    """
    t_blk = pl.program_id(1)

    @pl.when(t_blk == 0)
    def _init():
        h_scr[...] = jnp.zeros_like(h_scr)
        c_scr[...] = jnp.zeros_like(c_scr)

    whh = whh_ref[...]            # hoisted: loaded once per grid step
    Hp = h_scr.shape[1]
    TB = gx_ref.shape[0]

    def step(t, carry):
        h, c = carry
        # Only the recurrent matmul sits on the serial dependence chain.
        gates = gx_ref[t] + jnp.dot(h, whh, preferred_element_type=jnp.float32)
        # Hp is a multiple of 128 -> these slices are lane-aligned free views.
        i_g = jax.nn.sigmoid(gates[:, 0 * Hp:1 * Hp])
        f_g = jax.nn.sigmoid(gates[:, 1 * Hp:2 * Hp])
        g_g = jnp.tanh(gates[:, 2 * Hp:3 * Hp])
        o_g = jax.nn.sigmoid(gates[:, 3 * Hp:4 * Hp])
        c = f_g * c + i_g * g_g
        h = o_g * jnp.tanh(c)
        return (h, c)

    h, c = jax.lax.fori_loop(0, TB, step, (h_scr[...], c_scr[...]),
                             unroll=min(TB, 8))
    h_scr[...] = h
    c_scr[...] = c

    @pl.when(t_blk == pl.num_programs(1) - 1)
    def _finalize():
        h_out_ref[...] = h.astype(h_out_ref.dtype)


@functools.partial(jax.jit, static_argnames=())
def simple_lstm_forward(x, w_ih, w_hh, b_ih, b_hh, fc_w, fc_b):
    """x: (B, T, D) f32.  Params in PyTorch layout:
       w_ih (4H, D), w_hh (4H, H), b_ih/b_hh (4H,), fc_w (1, H), fc_b (1,).
       Returns (fc_out (B, 1), o_last (B, H)) like the torch module."""
    B, T, D = x.shape
    H = w_hh.shape[1]

    Hp = _round_up(H, 128)        # lane-aligned gate blocks
    Bp = _round_up(B, 8)          # sublane-dense batch
    BB = min(Bp, 128)
    Bp = _round_up(Bp, BB)

    # ---- Parallel phase: input projection + bias as one big dense matmul. ----
    x_tm = jnp.transpose(x, (1, 0, 2))                                 # (T, B, D)
    gates_x = jnp.einsum('tbd,gd->tbg', x_tm, w_ih) + (b_ih + b_hh)    # (T, B, 4H)

    # Pad per-gate so the 4H axis becomes 4*Hp with each gate block lane-aligned.
    # Padded gate pre-activations are exactly 0 -> padded h/c stay 0 forever.
    gates_x = gates_x.reshape(T, B, 4, H)
    gates_x = jnp.pad(gates_x, ((0, 0), (0, Bp - B), (0, 0), (0, Hp - H)))
    gates_x = gates_x.reshape(T, Bp, 4 * Hp)

    # Pad W_hh per-gate and pre-transpose: (4H, H) -> (Hp, 4*Hp).
    whh = jnp.pad(w_hh.reshape(4, H, H), ((0, 0), (0, Hp - H), (0, Hp - H)))
    whh_t = jnp.transpose(whh, (2, 0, 1)).reshape(Hp, 4 * Hp)

    TB = _pick_time_block(T, BB, 4 * Hp)
    n_t = T // TB

    # ---- Serial phase: recurrence only, inside one Pallas kernel. ----
    h_last_p = pl.pallas_call(
        lstm_kernel,
        out_shape=jax.ShapeDtypeStruct((Bp, Hp), jnp.float32),
        grid_spec=pltpu.PrefetchScalarGridSpec(
            num_scalar_prefetch=0,
            grid=(Bp // BB, n_t),
            in_specs=[
                pl.BlockSpec((TB, BB, 4 * Hp), lambda b, t: (t, b, 0)),  # gate slab
                pl.BlockSpec((Hp, 4 * Hp), lambda b, t: (0, 0)),         # W_hh^T
            ],
            out_specs=pl.BlockSpec((BB, Hp), lambda b, t: (b, 0)),
            scratch_shapes=[pltpu.VMEM((BB, Hp), jnp.float32),           # h state
                            pltpu.VMEM((BB, Hp), jnp.float32)],          # c state
        ),
        compiler_params=pltpu.CompilerParams(
            dimension_semantics=("parallel", "arbitrary"),
            vmem_limit_bytes=64 * 1024 * 1024),
    )(gates_x, whh_t)

    h_last = h_last_p[:B, :H]
    fc_out = h_last @ fc_w.T + fc_b        # trivial GEMV: leave to XLA
    return fc_out, h_last


def reference_forward(x, w_ih, w_hh, b_ih, b_hh, fc_w, fc_b):
    """Pure-JAX reference matching PyTorch nn.LSTM + Linear semantics."""
    B, T, D = x.shape
    H = w_hh.shape[1]
    wih_t, whh_t, b = w_ih.T, w_hh.T, b_ih + b_hh

    def step(carry, x_t):
        h, c = carry
        gates = x_t @ wih_t + h @ whh_t + b
        i_g = jax.nn.sigmoid(gates[:, 0 * H:1 * H])
        f_g = jax.nn.sigmoid(gates[:, 1 * H:2 * H])
        g_g = jnp.tanh(gates[:, 2 * H:3 * H])
        o_g = jax.nn.sigmoid(gates[:, 3 * H:4 * H])
        c_new = f_g * c + i_g * g_g
        h_new = o_g * jnp.tanh(c_new)
        return (h_new, c_new), None

    h0 = jnp.zeros((B, H), jnp.float32)
    c0 = jnp.zeros((B, H), jnp.float32)
    (h_last, _), _ = jax.lax.scan(step, (h0, c0), jnp.transpose(x, (1, 0, 2)))
    return h_last @ fc_w.T + fc_b, h_last


def init_params(key, input_dim, hidden_dim):
    """PyTorch-default-style init U(-1/sqrt(H), 1/sqrt(H)), PyTorch layouts."""
    k = 1.0 / jnp.sqrt(jnp.float32(hidden_dim))
    ks = jax.random.split(key, 6)
    u = lambda kk, shape: jax.random.uniform(kk, shape, jnp.float32, -k, k)
    w_ih = u(ks[0], (4 * hidden_dim, input_dim))
    w_hh = u(ks[1], (4 * hidden_dim, hidden_dim))
    b_ih = u(ks[2], (4 * hidden_dim,))
    b_hh = u(ks[3], (4 * hidden_dim,))
    fc_w = u(ks[4], (1, hidden_dim))
    fc_b = u(ks[5], (1,))
    return w_ih, w_hh, b_ih, b_hh, fc_w, fc_b


if __name__ == "__main__":
    B, T, D_IN, HID = 2, 8, 16, 32

    key = jax.random.PRNGKey(0)
    k_x, k_p = jax.random.split(key)
    x = jax.random.normal(k_x, (B, T, D_IN), jnp.float32)
    params = init_params(k_p, D_IN, HID)

    fc_out, o_last = simple_lstm_forward(x, *params)
    jax.block_until_ready((fc_out, o_last))

    ref_fc, ref_o = reference_forward(x, *params)
    assert fc_out.shape == (B, 1) and o_last.shape == (B, HID)
    assert jnp.allclose(fc_out, ref_fc, atol=1e-4, rtol=1e-4)
    assert jnp.allclose(o_last, ref_o, atol=1e-4, rtol=1e-4)

    print("KERNEL_OK")
</pallas_src>

<mosaic_0001>
module attributes {stable_mosaic.version = 11 : i64} {
  func.func @lstm_kernel(%arg0: i32, %arg1: i32, %arg2: memref<8x8x512xf32, #tpu.memory_space<vmem>>, %arg3: memref<128x512xf32, #tpu.memory_space<vmem>>, %arg4: memref<8x128xf32, #tpu.memory_space<vmem>>, %arg5: memref<8x128xf32, #tpu.memory_space<vmem>>, %arg6: memref<8x128xf32, #tpu.memory_space<vmem>>) attributes {dimension_semantics = [#tpu.dimension_semantics<parallel>, #tpu.dimension_semantics<arbitrary>], iteration_bounds = array<i64: 1, 1>, scalar_prefetch = 0 : i64, scratch_operands = 2 : i64, tpu.core_type = #tpu.core_type<tc>, window_params = [{transform_indices = @transform_0, window_bounds = array<i64: 8, 8, 512>}, {pipeline_mode = #tpu.pipeline_mode<synchronous>, transform_indices = @transform_1, window_bounds = array<i64: 128, 512>}, {transform_indices = @transform_2, window_bounds = array<i64: 8, 128>}]} {
    %c0_i32 = arith.constant 0 : i32
    %0 = arith.cmpi eq, %arg1, %c0_i32 : i32
    %1 = arith.extui %0 : i1 to i32
    %c0_i32_0 = arith.constant 0 : i32
    %2 = arith.cmpi ne, %1, %c0_i32_0 : i32
    scf.if %2 {
      %cst_60 = arith.constant 0.000000e+00 : f32
      %251 = vector.broadcast %cst_60 : f32 to vector<8x128xf32>
      %c0_61 = arith.constant 0 : index
      %c0_62 = arith.constant 0 : index
      %252 = vector.load %arg5[%c0_61, %c0_62] : memref<8x128xf32, #tpu.memory_space<vmem>>, vector<8x128xf32>
      tpu.vector_store %arg5[%c0_61, %c0_62], %251 {strides = array<i32>} : memref<8x128xf32, #tpu.memory_space<vmem>>, vector<8x128xf32>,
      %cst_63 = arith.constant 0.000000e+00 : f32
      %253 = vector.broadcast %cst_63 : f32 to vector<8x128xf32>
      %c0_64 = arith.constant 0 : index
      %c0_65 = arith.constant 0 : index
      %254 = vector.load %arg6[%c0_64, %c0_65] : memref<8x128xf32, #tpu.memory_space<vmem>>, vector<8x128xf32>
      tpu.vector_store %arg6[%c0_64, %c0_65], %253 {strides = array<i32>} : memref<8x128xf32, #tpu.memory_space<vmem>>, vector<8x128xf32>,
    } else {
    }
    %c0 = arith.constant 0 : index
    %c0_1 = arith.constant 0 : index
    %3 = vector.load %arg3[%c0, %c0_1] : memref<128x512xf32, #tpu.memory_space<vmem>>, vector<128x512xf32>
    %c0_2 = arith.constant 0 : index
    %c0_3 = arith.constant 0 : index
    %4 = vector.load %arg5[%c0_2, %c0_3] : memref<8x128xf32, #tpu.memory_space<vmem>>, vector<8x128xf32>
    %c0_4 = arith.constant 0 : index
    %c0_5 = arith.constant 0 : index
    %5 = vector.load %arg6[%c0_4, %c0_5] : memref<8x128xf32, #tpu.memory_space<vmem>>, vector<8x128xf32>
    %c0_i32_6 = arith.constant 0 : i32
    %6 = arith.index_cast %c0_i32_6 : i32 to index
    %c0_7 = arith.constant 0 : index
    %c0_8 = arith.constant 0 : index
    %7 = vector.load %arg2[%6, %c0_7, %c0_8] : memref<8x8x512xf32, #tpu.memory_space<vmem>>, vector<1x8x512xf32>
    %8 = vector.shape_cast %7 : vector<1x8x512xf32> to vector<8x512xf32>
    %cst = arith.constant dense<0.000000e+00> : vector<8x512xf32>
    %9 = tpu.matmul %4, %3, %cst {dimension_numbers = #tpu.dot_dimension_numbers<[1], [0], [0], [1], [0, 0, 1, 1], [], []>} : vector<8x128xf32>, vector<128x512xf32>, vector<8x512xf32> -> vector<8x512xf32>
    %10 = arith.addf %8, %9 : vector<8x512xf32>
    %11 = vector.extract_strided_slice %10 {offsets = [0, 0], sizes = [8, 128], strides = [1, 1]} : vector<8x512xf32> to vector<8x128xf32>
    %12 = arith.negf %11 : vector<8x128xf32>
    %13 = math.exp %12 : vector<8x128xf32>
    %cst_9 = arith.constant 1.000000e+00 : f32
    %14 = vector.broadcast %cst_9 : f32 to vector<8x128xf32>
    %15 = arith.addf %14, %13 : vector<8x128xf32>
    %16 = arith.divf %14, %15 : vector<8x128xf32>
    %17 = vector.extract_strided_slice %10 {offsets = [0, 128], sizes = [8, 128], strides = [1, 1]} : vector<8x512xf32> to vector<8x128xf32>
    %18 = arith.negf %17 : vector<8x128xf32>
    %19 = math.exp %18 : vector<8x128xf32>
    %cst_10 = arith.constant 1.000000e+00 : f32
    %20 = vector.broadcast %cst_10 : f32 to vector<8x128xf32>
    %21 = arith.addf %20, %19 : vector<8x128xf32>
    %22 = arith.divf %20, %21 : vector<8x128xf32>
    %23 = vector.extract_strided_slice %10 {offsets = [0, 256], sizes = [8, 128], strides = [1, 1]} : vector<8x512xf32> to vector<8x128xf32>
    %24 = math.tanh %23 : vector<8x128xf32>
    %25 = vector.extract_strided_slice %10 {offsets = [0, 384], sizes = [8, 128], strides = [1, 1]} : vector<8x512xf32> to vector<8x128xf32>
    %26 = arith.negf %25 : vector<8x128xf32>
    %27 = math.exp %26 : vector<8x128xf32>
    %cst_11 = arith.constant 1.000000e+00 : f32
    %28 = vector.broadcast %cst_11 : f32 to vector<8x128xf32>
    %29 = arith.addf %28, %27 : vector<8x128xf32>
    %30 = arith.divf %28, %29 : vector<8x128xf32>
    %31 = arith.mulf %22, %5 : vector<8x128xf32>
    %32 = arith.mulf %16, %24 : vector<8x128xf32>
    %33 = arith.addf %31, %32 : vector<8x128xf32>
    %34 = math.tanh %33 : vector<8x128xf32>
    %35 = arith.mulf %30, %34 : vector<8x128xf32>
    %c1_i32 = arith.constant 1 : i32
    %36 = arith.index_cast %c1_i32 : i32 to index
    %c0_12 = arith.constant 0 : index
    %c0_13 = arith.constant 0 : index
    %37 = vector.load %arg2[%36, %c0_12, %c0_13] : memref<8x8x512xf32, #tpu.memory_space<vmem>>, vector<1x8x512xf32>
    %38 = vector.shape_cast %37 : vector<1x8x512xf32> to vector<8x512xf32>
    %cst_14 = arith.constant dense<0.000000e+00> : vector<8x512xf32>
    %39 = tpu.matmul %35, %3, %cst_14 {dimension_numbers = #tpu.dot_dimension_numbers<[1], [0], [0], [1], [0, 0, 1, 1], [], []>} : vector<8x128xf32>, vector<128x512xf32>, vector<8x512xf32> -> vector<8x512xf32>
    %40 = arith.addf %38, %39 : vector<8x512xf32>
    %41 = vector.extract_strided_slice %40 {offsets = [0, 0], sizes = [8, 128], strides = [1, 1]} : vector<8x512xf32> to vector<8x128xf32>
    %42 = arith.negf %41 : vector<8x128xf32>
    %43 = math.exp %42 : vector<8x128xf32>
    %cst_15 = arith.constant 1.000000e+00 : f32
    %44 = vector.broadcast %cst_15 : f32 to vector<8x128xf32>
    %45 = arith.addf %44, %43 : vector<8x128xf32>
    %46 = arith.divf %44, %45 : vector<8x128xf32>
    %47 = vector.extract_strided_slice %40 {offsets = [0, 128], sizes = [8, 128], strides = [1, 1]} : vector<8x512xf32> to vector<8x128xf32>
    %48 = arith.negf %47 : vector<8x128xf32>
    %49 = math.exp %48 : vector<8x128xf32>
    %cst_16 = arith.constant 1.000000e+00 : f32
    %50 = vector.broadcast %cst_16 : f32 to vector<8x128xf32>
    %51 = arith.addf %50, %49 : vector<8x128xf32>
    %52 = arith.divf %50, %51 : vector<8x128xf32>
    %53 = vector.extract_strided_slice %40 {offsets = [0, 256], sizes = [8, 128], strides = [1, 1]} : vector<8x512xf32> to vector<8x128xf32>
    %54 = math.tanh %53 : vector<8x128xf32>
    %55 = vector.extract_strided_slice %40 {offsets = [0, 384], sizes = [8, 128], strides = [1, 1]} : vector<8x512xf32> to vector<8x128xf32>
    %56 = arith.negf %55 : vector<8x128xf32>
    %57 = math.exp %56 : vector<8x128xf32>
    %cst_17 = arith.constant 1.000000e+00 : f32
    %58 = vector.broadcast %cst_17 : f32 to vector<8x128xf32>
    %59 = arith.addf %58, %57 : vector<8x128xf32>
    %60 = arith.divf %58, %59 : vector<8x128xf32>
    %61 = arith.mulf %52, %33 : vector<8x128xf32>
    %62 = arith.mulf %46, %54 : vector<8x128xf32>
    %63 = arith.addf %61, %62 : vector<8x128xf32>
    %64 = math.tanh %63 : vector<8x128xf32>
    %65 = arith.mulf %60, %64 : vector<8x128xf32>
    %c2_i32 = arith.constant 2 : i32
    %66 = arith.index_cast %c2_i32 : i32 to index
    %c0_18 = arith.constant 0 : index
    %c0_19 = arith.constant 0 : index
    %67 = vector.load %arg2[%66, %c0_18, %c0_19] : memref<8x8x512xf32, #tpu.memory_space<vmem>>, vector<1x8x512xf32>
    %68 = vector.shape_cast %67 : vector<1x8x512xf32> to vector<8x512xf32>
    %cst_20 = arith.constant dense<0.000000e+00> : vector<8x512xf32>
    %69 = tpu.matmul %65, %3, %cst_20 {dimension_numbers = #tpu.dot_dimension_numbers<[1], [0], [0], [1], [0, 0, 1, 1], [], []>} : vector<8x128xf32>, vector<128x512xf32>, vector<8x512xf32> -> vector<8x512xf32>
    %70 = arith.addf %68, %69 : vector<8x512xf32>
    %71 = vector.extract_strided_slice %70 {offsets = [0, 0], sizes = [8, 128], strides = [1, 1]} : vector<8x512xf32> to vector<8x128xf32>
    %72 = arith.negf %71 : vector<8x128xf32>
    %73 = math.exp %72 : vector<8x128xf32>
    %cst_21 = arith.constant 1.000000e+00 : f32
    %74 = vector.broadcast %cst_21 : f32 to vector<8x128xf32>
    %75 = arith.addf %74, %73 : vector<8x128xf32>
    %76 = arith.divf %74, %75 : vector<8x128xf32>
    %77 = vector.extract_strided_slice %70 {offsets = [0, 128], sizes = [8, 128], strides = [1, 1]} : vector<8x512xf32> to vector<8x128xf32>
    %78 = arith.negf %77 : vector<8x128xf32>
    %79 = math.exp %78 : vector<8x128xf32>
    %cst_22 = arith.constant 1.000000e+00 : f32
    %80 = vector.broadcast %cst_22 : f32 to vector<8x128xf32>
    %81 = arith.addf %80, %79 : vector<8x128xf32>
    %82 = arith.divf %80, %81 : vector<8x128xf32>
    %83 = vector.extract_strided_slice %70 {offsets = [0, 256], sizes = [8, 128], strides = [1, 1]} : vector<8x512xf32> to vector<8x128xf32>
    %84 = math.tanh %83 : vector<8x128xf32>
    %85 = vector.extract_strided_slice %70 {offsets = [0, 384], sizes = [8, 128], strides = [1, 1]} : vector<8x512xf32> to vector<8x128xf32>
    %86 = arith.negf %85 : vector<8x128xf32>
    %87 = math.exp %86 : vector<8x128xf32>
    %cst_23 = arith.constant 1.000000e+00 : f32
    %88 = vector.broadcast %cst_23 : f32 to vector<8x128xf32>
    %89 = arith.addf %88, %87 : vector<8x128xf32>
    %90 = arith.divf %88, %89 : vector<8x128xf32>
    %91 = arith.mulf %82, %63 : vector<8x128xf32>
    %92 = arith.mulf %76, %84 : vector<8x128xf32>
    %93 = arith.addf %91, %92 : vector<8x128xf32>
    %94 = math.tanh %93 : vector<8x128xf32>
    %95 = arith.mulf %90, %94 : vector<8x128xf32>
    %c3_i32 = arith.constant 3 : i32
    %96 = arith.index_cast %c3_i32 : i32 to index
    %c0_24 = arith.constant 0 : index
    %c0_25 = arith.constant 0 : index
    %97 = vector.load %arg2[%96, %c0_24, %c0_25] : memref<8x8x512xf32, #tpu.memory_space<vmem>>, vector<1x8x512xf32>
    %98 = vector.shape_cast %97 : vector<1x8x512xf32> to vector<8x512xf32>
    %cst_26 = arith.constant dense<0.000000e+00> : vector<8x512xf32>
    %99 = tpu.matmul %95, %3, %cst_26 {dimension_numbers = #tpu.dot_dimension_numbers<[1], [0], [0], [1], [0, 0, 1, 1], [], []>} : vector<8x128xf32>, vector<128x512xf32>, vector<8x512xf32> -> vector<8x512xf32>
    %100 = arith.addf %98, %99 : vector<8x512xf32>
    %101 = vector.extract_strided_slice %100 {offsets = [0, 0], sizes = [8, 128], strides = [1, 1]} : vector<8x512xf32> to vector<8x128xf32>
    %102 = arith.negf %101 : vector<8x128xf32>
    %103 = math.exp %102 : vector<8x128xf32>
    %cst_27 = arith.constant 1.000000e+00 : f32
    %104 = vector.broadcast %cst_27 : f32 to vector<8x128xf32>
    %105 = arith.addf %104, %103 : vector<8x128xf32>
    %106 = arith.divf %104, %105 : vector<8x128xf32>
    %107 = vector.extract_strided_slice %100 {offsets = [0, 128], sizes = [8, 128], strides = [1, 1]} : vector<8x512xf32> to vector<8x128xf32>
    %108 = arith.negf %107 : vector<8x128xf32>
    %109 = math.exp %108 : vector<8x128xf32>
    %cst_28 = arith.constant 1.000000e+00 : f32
    %110 = vector.broadcast %cst_28 : f32 to vector<8x128xf32>
    %111 = arith.addf %110, %109 : vector<8x128xf32>
    %112 = arith.divf %110, %111 : vector<8x128xf32>
    %113 = vector.extract_strided_slice %100 {offsets = [0, 256], sizes = [8, 128], strides = [1, 1]} : vector<8x512xf32> to vector<8x128xf32>
    %114 = math.tanh %113 : vector<8x128xf32>
    %115 = vector.extract_strided_slice %100 {offsets = [0, 384], sizes = [8, 128], strides = [1, 1]} : vector<8x512xf32> to vector<8x128xf32>
    %116 = arith.negf %115 : vector<8x128xf32>
    %117 = math.exp %116 : vector<8x128xf32>
    %cst_29 = arith.constant 1.000000e+00 : f32
    %118 = vector.broadcast %cst_29 : f32 to vector<8x128xf32>
    %119 = arith.addf %118, %117 : vector<8x128xf32>
    %120 = arith.divf %118, %119 : vector<8x128xf32>
    %121 = arith.mulf %112, %93 : vector<8x128xf32>
    %122 = arith.mulf %106, %114 : vector<8x128xf32>
    %123 = arith.addf %121, %122 : vector<8x128xf32>
    %124 = math.tanh %123 : vector<8x128xf32>
    %125 = arith.mulf %120, %124 : vector<8x128xf32>
    %c4_i32 = arith.constant 4 : i32
    %126 = arith.index_cast %c4_i32 : i32 to index
    %c0_30 = arith.constant 0 : index
    %c0_31 = arith.constant 0 : index
    %127 = vector.load %arg2[%126, %c0_30, %c0_31] : memref<8x8x512xf32, #tpu.memory_space<vmem>>, vector<1x8x512xf32>
    %128 = vector.shape_cast %127 : vector<1x8x512xf32> to vector<8x512xf32>
    %cst_32 = arith.constant dense<0.000000e+00> : vector<8x512xf32>
    %129 = tpu.matmul %125, %3, %cst_32 {dimension_numbers = #tpu.dot_dimension_numbers<[1], [0], [0], [1], [0, 0, 1, 1], [], []>} : vector<8x128xf32>, vector<128x512xf32>, vector<8x512xf32> -> vector<8x512xf32>
    %130 = arith.addf %128, %129 : vector<8x512xf32>
    %131 = vector.extract_strided_slice %130 {offsets = [0, 0], sizes = [8, 128], strides = [1, 1]} : vector<8x512xf32> to vector<8x128xf32>
    %132 = arith.negf %131 : vector<8x128xf32>
    %133 = math.exp %132 : vector<8x128xf32>
    %cst_33 = arith.constant 1.000000e+00 : f32
    %134 = vector.broadcast %cst_33 : f32 to vector<8x128xf32>
    %135 = arith.addf %134, %133 : vector<8x128xf32>
    %136 = arith.divf %134, %135 : vector<8x128xf32>
    %137 = vector.extract_strided_slice %130 {offsets = [0, 128], sizes = [8, 128], strides = [1, 1]} : vector<8x512xf32> to vector<8x128xf32>
    %138 = arith.negf %137 : vector<8x128xf32>
    %139 = math.exp %138 : vector<8x128xf32>
    %cst_34 = arith.constant 1.000000e+00 : f32
    %140 = vector.broadcast %cst_34 : f32 to vector<8x128xf32>
    %141 = arith.addf %140, %139 : vector<8x128xf32>
    %142 = arith.divf %140, %141 : vector<8x128xf32>
    %143 = vector.extract_strided_slice %130 {offsets = [0, 256], sizes = [8, 128], strides = [1, 1]} : vector<8x512xf32> to vector<8x128xf32>
    %144 = math.tanh %143 : vector<8x128xf32>
    %145 = vector.extract_strided_slice %130 {offsets = [0, 384], sizes = [8, 128], strides = [1, 1]} : vector<8x512xf32> to vector<8x128xf32>
    %146 = arith.negf %145 : vector<8x128xf32>
    %147 = math.exp %146 : vector<8x128xf32>
    %cst_35 = arith.constant 1.000000e+00 : f32
    %148 = vector.broadcast %cst_35 : f32 to vector<8x128xf32>
    %149 = arith.addf %148, %147 : vector<8x128xf32>
    %150 = arith.divf %148, %149 : vector<8x128xf32>
    %151 = arith.mulf %142, %123 : vector<8x128xf32>
    %152 = arith.mulf %136, %144 : vector<8x128xf32>
    %153 = arith.addf %151, %152 : vector<8x128xf32>
    %154 = math.tanh %153 : vector<8x128xf32>
    %155 = arith.mulf %150, %154 : vector<8x128xf32>
    %c5_i32 = arith.constant 5 : i32
    %156 = arith.index_cast %c5_i32 : i32 to index
    %c0_36 = arith.constant 0 : index
    %c0_37 = arith.constant 0 : index
    %157 = vector.load %arg2[%156, %c0_36, %c0_37] : memref<8x8x512xf32, #tpu.memory_space<vmem>>, vector<1x8x512xf32>
    %158 = vector.shape_cast %157 : vector<1x8x512xf32> to vector<8x512xf32>
    %cst_38 = arith.constant dense<0.000000e+00> : vector<8x512xf32>
    %159 = tpu.matmul %155, %3, %cst_38 {dimension_numbers = #tpu.dot_dimension_numbers<[1], [0], [0], [1], [0, 0, 1, 1], [], []>} : vector<8x128xf32>, vector<128x512xf32>, vector<8x512xf32> -> vector<8x512xf32>
    %160 = arith.addf %158, %159 : vector<8x512xf32>
    %161 = vector.extract_strided_slice %160 {offsets = [0, 0], sizes = [8, 128], strides = [1, 1]} : vector<8x512xf32> to vector<8x128xf32>
    %162 = arith.negf %161 : vector<8x128xf32>
    %163 = math.exp %162 : vector<8x128xf32>
    %cst_39 = arith.constant 1.000000e+00 : f32
    %164 = vector.broadcast %cst_39 : f32 to vector<8x128xf32>
    %165 = arith.addf %164, %163 : vector<8x128xf32>
    %166 = arith.divf %164, %165 : vector<8x128xf32>
    %167 = vector.extract_strided_slice %160 {offsets = [0, 128], sizes = [8, 128], strides = [1, 1]} : vector<8x512xf32> to vector<8x128xf32>
    %168 = arith.negf %167 : vector<8x128xf32>
    %169 = math.exp %168 : vector<8x128xf32>
    %cst_40 = arith.constant 1.000000e+00 : f32
    %170 = vector.broadcast %cst_40 : f32 to vector<8x128xf32>
    %171 = arith.addf %170, %169 : vector<8x128xf32>
    %172 = arith.divf %170, %171 : vector<8x128xf32>
    %173 = vector.extract_strided_slice %160 {offsets = [0, 256], sizes = [8, 128], strides = [1, 1]} : vector<8x512xf32> to vector<8x128xf32>
    %174 = math.tanh %173 : vector<8x128xf32>
    %175 = vector.extract_strided_slice %160 {offsets = [0, 384], sizes = [8, 128], strides = [1, 1]} : vector<8x512xf32> to vector<8x128xf32>
    %176 = arith.negf %175 : vector<8x128xf32>
    %177 = math.exp %176 : vector<8x128xf32>
    %cst_41 = arith.constant 1.000000e+00 : f32
    %178 = vector.broadcast %cst_41 : f32 to vector<8x128xf32>
    %179 = arith.addf %178, %177 : vector<8x128xf32>
    %180 = arith.divf %178, %179 : vector<8x128xf32>
    %181 = arith.mulf %172, %153 : vector<8x128xf32>
    %182 = arith.mulf %166, %174 : vector<8x128xf32>
    %183 = arith.addf %181, %182 : vector<8x128xf32>
    %184 = math.tanh %183 : vector<8x128xf32>
    %185 = arith.mulf %180, %184 : vector<8x128xf32>
    %c6_i32 = arith.constant 6 : i32
    %186 = arith.index_cast %c6_i32 : i32 to index
    %c0_42 = arith.constant 0 : index
    %c0_43 = arith.constant 0 : index
    %187 = vector.load %arg2[%186, %c0_42, %c0_43] : memref<8x8x512xf32, #tpu.memory_space<vmem>>, vector<1x8x512xf32>
    %188 = vector.shape_cast %187 : vector<1x8x512xf32> to vector<8x512xf32>
    %cst_44 = arith.constant dense<0.000000e+00> : vector<8x512xf32>
    %189 = tpu.matmul %185, %3, %cst_44 {dimension_numbers = #tpu.dot_dimension_numbers<[1], [0], [0], [1], [0, 0, 1, 1], [], []>} : vector<8x128xf32>, vector<128x512xf32>, vector<8x512xf32> -> vector<8x512xf32>
    %190 = arith.addf %188, %189 : vector<8x512xf32>
    %191 = vector.extract_strided_slice %190 {offsets = [0, 0], sizes = [8, 128], strides = [1, 1]} : vector<8x512xf32> to vector<8x128xf32>
    %192 = arith.negf %191 : vector<8x128xf32>
    %193 = math.exp %192 : vector<8x128xf32>
    %cst_45 = arith.constant 1.000000e+00 : f32
    %194 = vector.broadcast %cst_45 : f32 to vector<8x128xf32>
    %195 = arith.addf %194, %193 : vector<8x128xf32>
    %196 = arith.divf %194, %195 : vector<8x128xf32>
    %197 = vector.extract_strided_slice %190 {offsets = [0, 128], sizes = [8, 128], strides = [1, 1]} : vector<8x512xf32> to vector<8x128xf32>
    %198 = arith.negf %197 : vector<8x128xf32>
    %199 = math.exp %198 : vector<8x128xf32>
    %cst_46 = arith.constant 1.000000e+00 : f32
    %200 = vector.broadcast %cst_46 : f32 to vector<8x128xf32>
    %201 = arith.addf %200, %199 : vector<8x128xf32>
    %202 = arith.divf %200, %201 : vector<8x128xf32>
    %203 = vector.extract_strided_slice %190 {offsets = [0, 256], sizes = [8, 128], strides = [1, 1]} : vector<8x512xf32> to vector<8x128xf32>
    %204 = math.tanh %203 : vector<8x128xf32>
    %205 = vector.extract_strided_slice %190 {offsets = [0, 384], sizes = [8, 128], strides = [1, 1]} : vector<8x512xf32> to vector<8x128xf32>
    %206 = arith.negf %205 : vector<8x128xf32>
    %207 = math.exp %206 : vector<8x128xf32>
    %cst_47 = arith.constant 1.000000e+00 : f32
    %208 = vector.broadcast %cst_47 : f32 to vector<8x128xf32>
    %209 = arith.addf %208, %207 : vector<8x128xf32>
    %210 = arith.divf %208, %209 : vector<8x128xf32>
    %211 = arith.mulf %202, %183 : vector<8x128xf32>
    %212 = arith.mulf %196, %204 : vector<8x128xf32>
    %213 = arith.addf %211, %212 : vector<8x128xf32>
    %214 = math.tanh %213 : vector<8x128xf32>
    %215 = arith.mulf %210, %214 : vector<8x128xf32>
    %c7_i32 = arith.constant 7 : i32
    %216 = arith.index_cast %c7_i32 : i32 to index
    %c0_48 = arith.constant 0 : index
    %c0_49 = arith.constant 0 : index
    %217 = vector.load %arg2[%216, %c0_48, %c0_49] : memref<8x8x512xf32, #tpu.memory_space<vmem>>, vector<1x8x512xf32>
    %218 = vector.shape_cast %217 : vector<1x8x512xf32> to vector<8x512xf32>
    %cst_50 = arith.constant dense<0.000000e+00> : vector<8x512xf32>
    %219 = tpu.matmul %215, %3, %cst_50 {dimension_numbers = #tpu.dot_dimension_numbers<[1], [0], [0], [1], [0, 0, 1, 1], [], []>} : vector<8x128xf32>, vector<128x512xf32>, vector<8x512xf32> -> vector<8x512xf32>
    %220 = arith.addf %218, %219 : vector<8x512xf32>
    %221 = vector.extract_strided_slice %220 {offsets = [0, 0], sizes = [8, 128], strides = [1, 1]} : vector<8x512xf32> to vector<8x128xf32>
    %222 = arith.negf %221 : vector<8x128xf32>
    %223 = math.exp %222 : vector<8x128xf32>
    %cst_51 = arith.constant 1.000000e+00 : f32
    %224 = vector.broadcast %cst_51 : f32 to vector<8x128xf32>
    %225 = arith.addf %224, %223 : vector<8x128xf32>
    %226 = arith.divf %224, %225 : vector<8x128xf32>
    %227 = vector.extract_strided_slice %220 {offsets = [0, 128], sizes = [8, 128], strides = [1, 1]} : vector<8x512xf32> to vector<8x128xf32>
    %228 = arith.negf %227 : vector<8x128xf32>
    %229 = math.exp %228 : vector<8x128xf32>
    %cst_52 = arith.constant 1.000000e+00 : f32
    %230 = vector.broadcast %cst_52 : f32 to vector<8x128xf32>
    %231 = arith.addf %230, %229 : vector<8x128xf32>
    %232 = arith.divf %230, %231 : vector<8x128xf32>
    %233 = vector.extract_strided_slice %220 {offsets = [0, 256], sizes = [8, 128], strides = [1, 1]} : vector<8x512xf32> to vector<8x128xf32>
    %234 = math.tanh %233 : vector<8x128xf32>
    %235 = vector.extract_strided_slice %220 {offsets = [0, 384], sizes = [8, 128], strides = [1, 1]} : vector<8x512xf32> to vector<8x128xf32>
    %236 = arith.negf %235 : vector<8x128xf32>
    %237 = math.exp %236 : vector<8x128xf32>
    %cst_53 = arith.constant 1.000000e+00 : f32
    %238 = vector.broadcast %cst_53 : f32 to vector<8x128xf32>
    %239 = arith.addf %238, %237 : vector<8x128xf32>
    %240 = arith.divf %238, %239 : vector<8x128xf32>
    %241 = arith.mulf %232, %213 : vector<8x128xf32>
    %242 = arith.mulf %226, %234 : vector<8x128xf32>
    %243 = arith.addf %241, %242 : vector<8x128xf32>
    %244 = math.tanh %243 : vector<8x128xf32>
    %245 = arith.mulf %240, %244 : vector<8x128xf32>
    %c8_i32 = arith.constant 8 : i32
    %c0_54 = arith.constant 0 : index
    %c0_55 = arith.constant 0 : index
    %246 = vector.load %arg5[%c0_54, %c0_55] : memref<8x128xf32, #tpu.memory_space<vmem>>, vector<8x128xf32>
    tpu.vector_store %arg5[%c0_54, %c0_55], %245 {strides = array<i32>} : memref<8x128xf32, #tpu.memory_space<vmem>>, vector<8x128xf32>,
    %c0_56 = arith.constant 0 : index
    %c0_57 = arith.constant 0 : index
    %247 = vector.load %arg6[%c0_56, %c0_57] : memref<8x128xf32, #tpu.memory_space<vmem>>, vector<8x128xf32>
    tpu.vector_store %arg6[%c0_56, %c0_57], %243 {strides = array<i32>} : memref<8x128xf32, #tpu.memory_space<vmem>>, vector<8x128xf32>,
    %c0_i32_58 = arith.constant 0 : i32
    %248 = arith.cmpi eq, %arg1, %c0_i32_58 : i32
    %249 = arith.extui %248 : i1 to i32
    %c0_i32_59 = arith.constant 0 : i32
    %250 = arith.cmpi ne, %249, %c0_i32_59 : i32
    scf.if %250 {
      %c0_60 = arith.constant 0 : index
      %c0_61 = arith.constant 0 : index
      %251 = vector.load %arg4[%c0_60, %c0_61] : memref<8x128xf32, #tpu.memory_space<vmem>>, vector<8x128xf32>
      tpu.vector_store %arg4[%c0_60, %c0_61], %245 {strides = array<i32>} : memref<8x128xf32, #tpu.memory_space<vmem>>, vector<8x128xf32>,
    } else {
    }
    return
  }
  func.func @transform_0(%arg0: i32, %arg1: i32) -> (i32, i32, i32) {
    %c0_i32 = arith.constant 0 : i32
    %c0_i32_0 = arith.constant 0 : i32
    return %arg1, %arg0, %c0_i32 : i32, i32, i32
  }
  func.func @transform_1(%arg0: i32, %arg1: i32) -> (i32, i32) {
    %c0_i32 = arith.constant 0 : i32
    %c0_i32_0 = arith.constant 0 : i32
    %c0_i32_1 = arith.constant 0 : i32
    return %c0_i32, %c0_i32_0 : i32, i32
  }
  func.func @transform_2(%arg0: i32, %arg1: i32) -> (i32, i32) {
    %c0_i32 = arith.constant 0 : i32
    %c0_i32_0 = arith.constant 0 : i32
    return %arg0, %c0_i32 : i32, i32
  }
}

</mosaic_0001>

<bundles_post_ra>
// kernel: simple_lstm_forward.1
= control target key start
LH: loop header
LB: loop body
LE: loop exit
PB: predicated region body
PF: predicated region fallthrough
CT: control target
= control target key end

     0   :  { %v3051_v3 = vmov 0.0   ;;  %s3046_s1 = inlined_call_operand.vmem [shape: f32[128,512], index: 1, kind: input, shape index: {}]   ;;  %s3047_s0 = inlined_call_operand.vmem [shape: f32[8,8,512], index: 0, kind: input, shape index: {}]   ;;  %s3048_s2 = inlined_call_operand.vmem [shape: f32[8,128], index: 2, kind: output, shape index: {}]  }
   0x1   :  { %v1756_v0 = vld [vmem:[%s3046_s1 + $0x1e8] sm:$0xff]  ;;  %v1761_v1 = vld [vmem:[%s3046_s1 + $0x1e0] sm:$0xff]  ;;  %151 = vmatprep.mubr.f32.mxu0 %v3051_v3  ;;  %222 = vmatprep.mubr.f32.mxu1 %v3051_v3  ;;  %v1803_v9 = vld [vmem:[%s3046_s1 + $0x1f8] sm:$0xff] }
   0x2   :  { %3113 = vst [vmem:[#allocation4_spill] sm:$0xff] %v1756_v0  ;;  %v1766_v2 = vld [vmem:[%s3046_s1 + $0x1c8] sm:$0xff]  ;;  %87 = vmatprep.subr.mxu0 %v1756_v0  ;;  %v1774_v4 = vld [vmem:[%s3046_s1 + $0x1c0] sm:$0xff]  ;;  %3114 = vst [vmem:[#allocation5_spill] sm:$0xff] %v1803_v9  ;;  %158 = vmatprep.subr.mxu1 %v1803_v9 }
   0x3   :  { %88 = vmatpush1.msra.mxu0 %v1761_v1  ;;  %v1780_v5 = vld [vmem:[%s3046_s1 + $0x1a8] sm:$0xff]  ;;  %v1786_v6 = vld [vmem:[%s3046_s1 + $0x1a0] sm:$0xff]  ;;  %v1815_v11 = vld [vmem:[%s3046_s1 + $0x1f0] sm:$0xff] }
   0x4   :  { %89 = vmatprep.subr.mxu0 %v1766_v2  ;;  %v1792_v7 = vld [vmem:[%s3046_s1 + $0x188] sm:$0xff]  ;;  %v1798_v8 = vld [vmem:[%s3046_s1 + $0x180] sm:$0xff]  ;;  %159 = vmatpush1.msra.mxu1 %v1815_v11  ;;  %v1827_v13 = vld [vmem:[%s3046_s1 + $0x1d8] sm:$0xff] }
   0x5   :  { %90 = vmatpush1.msra.mxu0 %v1774_v4  ;;  %v1809_v10 = vld [vmem:[%s3046_s1 + $0x168] sm:$0xff]  ;;  %v1821_v12 = vld [vmem:[%s3046_s1 + $0x160] sm:$0xff]  ;;  %v1832_v14 = vld [vmem:[%s3046_s1 + $0x1d0] sm:$0xff]  ;;  %160 = vmatprep.subr.mxu1 %v1827_v13 }
   0x6   :  { %91 = vmatprep.subr.mxu0 %v1780_v5  ;;  %v1838_v15 = vld [vmem:[%s3046_s1 + $0x148] sm:$0xff]  ;;  %v1844_v16 = vld [vmem:[%s3046_s1 + $0x1b8] sm:$0xff]  ;;  %v1850_v17 = vld [vmem:[%s3046_s1 + $0x140] sm:$0xff]  ;;  %161 = vmatpush1.msra.mxu1 %v1832_v14 }
   0x7   :  { %92 = vmatpush1.msra.mxu0 %v1786_v6  ;;  %v1856_v18 = vld [vmem:[%s3046_s1 + $0x1b0] sm:$0xff]  ;;  %v1861_v19 = vld [vmem:[%s3046_s1 + $0x198] sm:$0xff]  ;;  %v1867_v20 = vld [vmem:[%s3046_s1 + $0x128] sm:$0xff]  ;;  %162 = vmatprep.subr.mxu1 %v1844_v16 }
   0x8   :  { %93 = vmatprep.subr.mxu0 %v1792_v7  ;;  %v1873_v21 = vld [vmem:[%s3046_s1 + $0x190] sm:$0xff]  ;;  %v1879_v22 = vld [vmem:[%s3046_s1 + $0x120] sm:$0xff]  ;;  %163 = vmatpush1.msra.mxu1 %v1856_v18  ;;  %v1885_v23 = vld [vmem:[%s3046_s1 + $0x178] sm:$0xff] }
   0x9   :  { %94 = vmatpush1.msra.mxu0 %v1798_v8  ;;  %v1891_v24 = vld [vmem:[%s3046_s1 + $0x108] sm:$0xff]  ;;  %164 = vmatprep.subr.mxu1 %v1861_v19  ;;  %v1897_v25 = vld [vmem:[%s3046_s1 + $0x170] sm:$0xff]  ;;  %v1903_v26 = vld [vmem:[%s3046_s1 + $0x100] sm:$0xff] }
   0xa   :  { %95 = vmatprep.subr.mxu0 %v1809_v10  ;;  %165 = vmatpush1.msra.mxu1 %v1873_v21  ;;  %v1909_v27 = vld [vmem:[%s3046_s1 + $0x158] sm:$0xff]  ;;  %v1915_v28 = vld [vmem:[%s3046_s1 + $0xe8] sm:$0xff]  ;;  %v1921_v29 = vld [vmem:[%s3046_s1 + $0x150] sm:$0xff] }
   0xb   :  { %96 = vmatpush1.msra.mxu0 %v1821_v12  ;;  %166 = vmatprep.subr.mxu1 %v1885_v23  ;;  %v1927_v30 = vld [vmem:[%s3046_s1 + $0xe0] sm:$0xff]  ;;  %v1933_v31 = vld [vmem:[%s3046_s1 + $0x138] sm:$0xff]  ;;  %v1939_v32 = vld [vmem:[%s3046_s1 + $0xc8] sm:$0xff] }
   0xc   :  { %97 = vmatprep.subr.mxu0 %v1838_v15  ;;  %167 = vmatpush1.msra.mxu1 %v1897_v25  ;;  %v1945_v33 = vld [vmem:[%s3046_s1 + $0x130] sm:$0xff]  ;;  %v1951_v34 = vld [vmem:[%s3046_s1 + $0xc0] sm:$0xff]  ;;  %v1957_v35 = vld [vmem:[%s3046_s1 + $0x118] sm:$0xff] }
   0xd   :  { %98 = vmatpush1.msra.mxu0 %v1850_v17  ;;  %168 = vmatprep.subr.mxu1 %v1909_v27  ;;  %v1963_v36 = vld [vmem:[%s3046_s1 + $0xa8] sm:$0xff]  ;;  %v1969_v37 = vld [vmem:[%s3046_s1 + $0x110] sm:$0xff]  ;;  %v1975_v38 = vld [vmem:[%s3046_s1 + $0xa0] sm:$0xff] }
   0xe   :  { %99 = vmatprep.subr.mxu0 %v1867_v20  ;;  %169 = vmatpush1.msra.mxu1 %v1921_v29  ;;  %v1981_v39 = vld [vmem:[%s3046_s1 + $0xf8] sm:$0xff]  ;;  %v1987_v40 = vld [vmem:[%s3046_s1 + $0x88] sm:$0xff]  ;;  %v1993_v41 = vld [vmem:[%s3046_s1 + $0xf0] sm:$0xff] }
   0xf   :  { %100 = vmatpush1.msra.mxu0 %v1879_v22  ;;  %170 = vmatprep.subr.mxu1 %v1933_v31  ;;  %v1999_v42 = vld [vmem:[%s3046_s1 + $0x80] sm:$0xff]  ;;  %v2005_v43 = vld [vmem:[%s3046_s1 + $0xd8] sm:$0xff]  ;;  %v2011_v44 = vld [vmem:[%s3046_s1 + $0x68] sm:$0xff] }
  0x10   :  { %101 = vmatprep.subr.mxu0 %v1891_v24  ;;  %171 = vmatpush1.msra.mxu1 %v1945_v33  ;;  %3115 = vst [vmem:[#allocation6_spill] sm:$0xff] %v2011_v44  ;;  %v2017_v45 = vld [vmem:[%s3046_s1 + $0xd0] sm:$0xff]  ;;  %v2023_v46 = vld [vmem:[%s3046_s1 + $0x60] sm:$0xff]  ;;  %v2029_v47 = vld [vmem:[%s3046_s1 + $0xb8] sm:$0xff] }
  0x11   :  { %102 = vmatpush1.msra.mxu0 %v1903_v26  ;;  %172 = vmatprep.subr.mxu1 %v1957_v35  ;;  %3116 = vst [vmem:[#allocation7_spill] sm:$0xff] %v2023_v46  ;;  %v2035_v48 = vld [vmem:[%s3046_s1 + $0x48] sm:$0xff]  ;;  %v2041_v49 = vld [vmem:[%s3046_s1 + $0xb0] sm:$0xff]  ;;  %v2047_v50 = vld [vmem:[%s3046_s1 + $0x40] sm:$0xff] }
  0x12   :  { %103 = vmatprep.subr.mxu0 %v1915_v28  ;;  %173 = vmatpush1.msra.mxu1 %v1969_v37  ;;  %3117 = vst [vmem:[#allocation8_spill] sm:$0xff] %v2035_v48  ;;  %3118 = vst [vmem:[#allocation9_spill] sm:$0xff] %v2047_v50  ;;  %v2053_v51 = vld [vmem:[%s3046_s1 + $0x98] sm:$0xff]  ;;  %v2059_v52 = vld [vmem:[%s3046_s1 + $0x28] sm:$0xff] }
  0x13   :  { %104 = vmatpush1.msra.mxu0 %v1927_v30  ;;  %174 = vmatprep.subr.mxu1 %v1981_v39  ;;  %3119 = vst [vmem:[#allocation10_spill] sm:$0xff] %v2059_v52  ;;  %v2065_v53 = vld [vmem:[%s3046_s1 + $0x90] sm:$0xff]  ;;  %v2071_v54 = vld [vmem:[%s3046_s1 + $0x20] sm:$0xff]  ;;  %v2077_v55 = vld [vmem:[%s3046_s1 + $0x78] sm:$0xff] }
  0x14   :  { %105 = vmatprep.subr.mxu0 %v1939_v32  ;;  %175 = vmatpush1.msra.mxu1 %v1993_v41  ;;  %3120 = vst [vmem:[#allocation11_spill] sm:$0xff] %v2065_v53  ;;  %3121 = vst [vmem:[#allocation12_spill] sm:$0xff] %v2071_v54  ;;  %v2083_v56 = vld [vmem:[%s3046_s1 + $0x8] sm:$0xff]  ;;  %v2089_v57 = vld [vmem:[%s3046_s1 + $0x70] sm:$0xff] }
  0x15   :  { %106 = vmatpush1.msra.mxu0 %v1951_v34  ;;  %176 = vmatprep.subr.mxu1 %v2005_v43  ;;  %3122 = vst [vmem:[#allocation13_spill] sm:$0xff] %v2077_v55  ;;  %3123 = vst [vmem:[#allocation14_spill] sm:$0xff] %v2083_v56  ;;  %v2095_v58 = vld [vmem:[%s3046_s1] sm:$0xff]  ;;  %v2101_v59 = vld [vmem:[%s3046_s1 + $0x58] sm:$0xff] }
  0x16   :  { %107 = vmatprep.subr.mxu0 %v1963_v36  ;;  %177 = vmatpush1.msra.mxu1 %v2017_v45  ;;  %3124 = vst [vmem:[#allocation15_spill] sm:$0xff] %v2089_v57  ;;  %3125 = vst [vmem:[#allocation16_spill] sm:$0xff] %v2095_v58  ;;  %v2108_v60 = vld [vmem:[%s3046_s1 + $0x50] sm:$0xff]  ;;  %v2115_v61 = vld [vmem:[%s3046_s1 + $0x38] sm:$0xff] }
  0x17   :  { %108 = vmatpush1.msra.mxu0 %v1975_v38  ;;  %178 = vmatprep.subr.mxu1 %v2029_v47  ;;  %3126 = vst [vmem:[#allocation17_spill] sm:$0xff] %v2101_v59  ;;  %3127 = vst [vmem:[#allocation18_spill] sm:$0xff] %v2108_v60  ;;  %v2122_v62 = vld [vmem:[%s3046_s1 + $0x30] sm:$0xff]  ;;  %v2129_v63 = vld [vmem:[%s3046_s1 + $0x18] sm:$0xff] }
  0x18   :  { %109 = vmatprep.subr.mxu0 %v1987_v40  ;;  %179 = vmatpush1.msra.mxu1 %v2041_v49  ;;  %3128 = vst [vmem:[#allocation19_spill] sm:$0xff] %v2115_v61  ;;  %3129 = vst [vmem:[#allocation20_spill] sm:$0xff] %v2122_v62 }
  0x19   :  { %110 = vmatpush1.msra.mxu0 %v1999_v42  ;;  %180 = vmatprep.subr.mxu1 %v2053_v51  ;;  %3130 = vst [vmem:[#allocation21_spill] sm:$0xff] %v2129_v63 }
  0x1a   :  { %111 = vmatprep.subr.mxu0 %v2011_v44  ;;  %181 = vmatpush1.msra.mxu1 %v2065_v53 }
  0x1b   :  { %112 = vmatpush1.msra.mxu0 %v2023_v46  ;;  %182 = vmatprep.subr.mxu1 %v2077_v55 }
  0x1c   :  { %113 = vmatprep.subr.mxu0 %v2035_v48  ;;  %183 = vmatpush1.msra.mxu1 %v2089_v57 }
  0x1d   :  { %114 = vmatpush1.msra.mxu0 %v2047_v50  ;;  %184 = vmatprep.subr.mxu1 %v2101_v59 }
  0x1e   :  { %115 = vmatprep.subr.mxu0 %v2059_v52  ;;  %185 = vmatpush1.msra.mxu1 %v2108_v60 }
  0x1f   :  { %116 = vmatpush1.msra.mxu0 %v2071_v54  ;;  %186 = vmatprep.subr.mxu1 %v2115_v61 }
  0x20   :  { %117 = vmatprep.subr.mxu0 %v2083_v56  ;;  %187 = vmatpush1.msra.mxu1 %v2122_v62 }
  0x21   :  { %118 = vmatpush1.msra.mxu0 %v2095_v58  ;;  %v2135_v58 = vld [vmem:[%s3046_s1 + $0x10] sm:$0xff]  ;;  %188 = vmatprep.subr.mxu1 %v2129_v63 }
  0x22   :  { %152 = vmatmul.mubr.f32.vlgmr.msra.gmra.mxu0 %v3051_v3  ;;  %3131 = vst [vmem:[#allocation22_spill] sm:$0xff] %v2135_v58  ;;  %262 = vmatprep.subr.mxu0 %v1756_v0 }
  0x23   :  { %263 = vmatpush1.msra.mxu0 %v1761_v1  ;;  %189 = vmatpush1.msra.mxu1 %v2135_v58 }
  0x24   :  { %264 = vmatprep.subr.mxu0 %v1766_v2  ;;  %223 = vmatmul.mubr.f32.vlgmr.msra.gmra.mxu1 %v3051_v3  ;;  %v3132_v3 = vld [vmem:[#allocation16_spill] sm:$0xff] }
  0x25   :  { %265 = vmatpush1.msra.mxu0 %v1774_v4  ;;  %333 = vmatprep.subr.mxu1 %v1803_v9 }
  0x26   :  { %334 = vmatpush1.msra.mxu1 %v1815_v11  ;;  %266 = vmatprep.subr.mxu0 %v1780_v5 }
  0x27   :  { %335 = vmatprep.subr.mxu1 %v1827_v13  ;;  %267 = vmatpush1.msra.mxu0 %v1786_v6 }
  0x28   :  { %336 = vmatpush1.msra.mxu1 %v1832_v14  ;;  %268 = vmatprep.subr.mxu0 %v1792_v7 }
  0x29   :  { %337 = vmatprep.subr.mxu1 %v1844_v16  ;;  %269 = vmatpush1.msra.mxu0 %v1798_v8 }
  0x2a   :  { %338 = vmatpush1.msra.mxu1 %v1856_v18  ;;  %270 = vmatprep.subr.mxu0 %v1809_v10 }
  0x2b   :  { %339 = vmatprep.subr.mxu1 %v1861_v19  ;;  %271 = vmatpush1.msra.mxu0 %v1821_v12 }
  0x2c   :  { %340 = vmatpush1.msra.mxu1 %v1873_v21  ;;  %272 = vmatprep.subr.mxu0 %v1838_v15 }
  0x2d   :  { %341 = vmatprep.subr.mxu1 %v1885_v23  ;;  %273 = vmatpush1.msra.mxu0 %v1850_v17 }
  0x2e   :  { %342 = vmatpush1.msra.mxu1 %v1897_v25  ;;  %274 = vmatprep.subr.mxu0 %v1867_v20 }
  0x2f   :  { %343 = vmatprep.subr.mxu1 %v1909_v27  ;;  %275 = vmatpush1.msra.mxu0 %v1879_v22 }
  0x30   :  { %344 = vmatpush1.msra.mxu1 %v1921_v29  ;;  %276 = vmatprep.subr.mxu0 %v1891_v24 }
  0x31   :  { %345 = vmatprep.subr.mxu1 %v1933_v31  ;;  %277 = vmatpush1.msra.mxu0 %v1903_v26 }
  0x32   :  { %346 = vmatpush1.msra.mxu1 %v1945_v33  ;;  %278 = vmatprep.subr.mxu0 %v1915_v28 }
  0x33   :  { %347 = vmatprep.subr.mxu1 %v1957_v35  ;;  %279 = vmatpush1.msra.mxu0 %v1927_v30 }
  0x34   :  { %348 = vmatpush1.msra.mxu1 %v1969_v37  ;;  %280 = vmatprep.subr.mxu0 %v1939_v32 }
  0x35   :  { %349 = vmatprep.subr.mxu1 %v1981_v39  ;;  %281 = vmatpush1.msra.mxu0 %v1951_v34 }
  0x36   :  { %350 = vmatpush1.msra.mxu1 %v1993_v41  ;;  %282 = vmatprep.subr.mxu0 %v1963_v36 }
  0x37   :  { %351 = vmatprep.subr.mxu1 %v2005_v43  ;;  %283 = vmatpush1.msra.mxu0 %v1975_v38 }
  0x38   :  { %352 = vmatpush1.msra.mxu1 %v2017_v45  ;;  %284 = vmatprep.subr.mxu0 %v1987_v40 }
  0x39   :  { %353 = vmatprep.subr.mxu1 %v2029_v47  ;;  %285 = vmatpush1.msra.mxu0 %v1999_v42 }
  0x3a   :  { %354 = vmatpush1.msra.mxu1 %v2041_v49  ;;  %286 = vmatprep.subr.mxu0 %v2011_v44 }
  0x3b   :  { %355 = vmatprep.subr.mxu1 %v2053_v51  ;;  %287 = vmatpush1.msra.mxu0 %v2023_v46 }
  0x3c   :  { %356 = vmatpush1.msra.mxu1 %v2065_v53  ;;  %288 = vmatprep.subr.mxu0 %v2035_v48  ;;  %v3133_v48 = vmov 0.0  }
  0x3d   :  { %357 = vmatprep.subr.mxu1 %v2077_v55  ;;  %289 = vmatpush1.msra.mxu0 %v2047_v50 }
  0x3e   :  { %358 = vmatpush1.msra.mxu1 %v2089_v57  ;;  %290 = vmatprep.subr.mxu0 %v2059_v52 }
  0x3f   :  { %359 = vmatprep.subr.mxu1 %v2101_v59  ;;  %291 = vmatpush1.msra.mxu0 %v2071_v54 }
  0x40   :  { %360 = vmatpush1.msra.mxu1 %v2108_v60  ;;  %292 = vmatprep.subr.mxu0 %v2083_v56  ;;  %v83_v56 = vld [vmem:[%s3047_s0] sm:$0xff]  ;;  %v85_v60 = vld [vmem:[%s3047_s0 + $0x10] sm:$0xff] }
  0x41   :  { %361 = vmatprep.subr.mxu1 %v2115_v61  ;;  %293 = vmatpush1.msra.mxu0 %v3132_v3  ;;  %v84_v3 = vld [vmem:[%s3047_s0 + $0x8] sm:$0xff] }
  0x42   :  { %362 = vmatpush1.msra.mxu1 %v2122_v62  ;;  %326 = vmatprep.mubr.f32.mxu0 %v3133_v48 }
  0x43   :  { %363 = vmatprep.subr.mxu1 %v2129_v63  ;;  %397 = vmatprep.mubr.f32.mxu1 %v3133_v48 }
  0x44   :  { %364 = vmatpush1.msra.mxu1 %v2135_v58  ;;  %437 = vmatprep.subr.mxu0 %v1756_v0 }
  0x45   :  { %508 = vmatprep.subr.mxu1 %v1803_v9  ;;  %v86_v9 = vld [vmem:[%s3047_s0 + $0x18] sm:$0xff] }
  0xe2   :  { %v153_v54 = vpop.f32.mrf.mxu0 }
  0xe3   :  { %v229_v62 = vadd.f32 %v153_v54, %v83_v56 }
  0xe4   :  { %v155_v61 = vpop.f32.mrf.mxu0  ;;  %v224_v58 = vpop.f32.mrf.mxu1 }
  0xe5   :  { %v1492_v63 = vmul.f32 -1.442695, %v229_v62  ;;  %v230_v52 = vadd.f32 %v155_v61, %v84_v3  ;;  %v231_v59 = vadd.f32 %v224_v58, %v85_v60  ;;  %v3138_v58 = vld [vmem:[#allocation15_spill] sm:$0xff]  ;;  %v3140_v60 = vld [vmem:[#allocation17_spill] sm:$0xff] }
  0xe6   :  { %v226_v0 = vpop.f32.mrf.mxu1 }
  0xe7   :  { %1545 = vpow2.f32 %v1492_v63  ;;  %v1493_v48 = vmul.f32 -1.442695, %v230_v52  ;;  %v232_v50 = vadd.f32 %v226_v0, %v86_v9 }
  0xe9   :  { %1547 = vpow2.f32 %v1493_v48  ;;  %v1494_v57 = vmul.f32 -1.442695, %v232_v50 }
  0xea   :  { %1549 = vtanh.f32 %v231_v59  ;;  %v3139_v59 = vld [vmem:[#allocation8_spill] sm:$0xff] }
  0xeb   :  { %1551 = vpow2.f32 %v1494_v57  ;;  %v3137_v57 = vld [vmem:[#allocation7_spill] sm:$0xff] }
  0xf4   :  { %v1546_v54 = vpop.eup %1545 }
  0xf5   :  { %v236_v56 = vadd.f32 1.0, %v1546_v54  ;;  %v3141_v54 = vld [vmem:[#allocation9_spill] sm:$0xff] }
  0xf6   :  { %v1548_v3 = vpop.eup %1547 }
  0xf7   :  { %1553 = vrcp.f32 %v236_v56  ;;  %v242_v52 = vadd.f32 1.0, %v1548_v3  ;;  %v1550_v48 = vpop.eup %1549  ;;  %v3142_v56 = vld [vmem:[#allocation18_spill] sm:$0xff] }
  0xf8   :  { %v1552_v61 = vpop.eup %1551  ;;  %v3143_v3 = vld [vmem:[#allocation10_spill] sm:$0xff] }
  0xf9   :  { %1555 = vrcp.f32 %v242_v52  ;;  %v249_v46 = vadd.f32 1.0, %v1552_v61  ;;  %v3144_v52 = vld [vmem:[#allocation19_spill] sm:$0xff]  ;;  %v3146_v61 = vld [vmem:[#allocation20_spill] sm:$0xff] }
  0xfb   :  { %1557 = vrcp.f32 %v249_v46  ;;  %v3135_v46 = vld [vmem:[#allocation6_spill] sm:$0xff] }
 0x104   :  { %v1554_v62 = vpop.eup %1553 }
 0x105   :  { %v253_v44 = vmul.f32 %v1554_v62, %v1550_v48  ;;  %v3145_v48 = vld [vmem:[#allocation12_spill] sm:$0xff]  ;;  %v3147_v62 = vld [vmem:[#allocation14_spill] sm:$0xff] }
 0x106   :  { %v1556_v63 = vpop.eup %1555 }
 0x107   :  { %v252_v55 = vmul.f32 0.0, %v1556_v63  ;;  %v3148_v63 = vld [vmem:[#allocation21_spill] sm:$0xff] }
 0x108   :  { %v1558_v0 = vpop.eup %1557 }
 0x109   :  { %v2221_v53 = vadd.f32 %v253_v44, %v252_v55  ;;  %v3134_v44 = vld [vmem:[#allocation11_spill] sm:$0xff]  ;;  %v3136_v55 = vld [vmem:[#allocation13_spill] sm:$0xff] }
 0x10b   :  { %1559 = vtanh.f32 %v2221_v53 }
 0x118   :  { %v1560_v9 = vpop.eup %1559 }
 0x119   :  { %v256_v50 = vmul.f32 %v1560_v9, %v1558_v0  ;;  %v3149_v0 = vld [vmem:[#allocation16_spill] sm:$0xff]  ;;  %v3150_v9 = vmov 0.0  }
 0x11b   :  { %327 = vmatmul.mubr.f32.vlgmr.msra.gmra.mxu0 %v256_v50  ;;  %398 = vmatmul.mubr.f32.vlgmr.msra.gmra.mxu1 %v256_v50  ;;  %v3151_v50 = vld [vmem:[#allocation22_spill] sm:$0xff] }
 0x11c   :  { %438 = vmatpush1.msra.mxu0 %v1761_v1  ;;  %509 = vmatpush1.msra.mxu1 %v1815_v11 }
 0x11d   :  { %439 = vmatprep.subr.mxu0 %v1766_v2  ;;  %510 = vmatprep.subr.mxu1 %v1827_v13 }
 0x11e   :  { %440 = vmatpush1.msra.mxu0 %v1774_v4  ;;  %511 = vmatpush1.msra.mxu1 %v1832_v14 }
 0x11f   :  { %441 = vmatprep.subr.mxu0 %v1780_v5  ;;  %512 = vmatprep.subr.mxu1 %v1844_v16 }
 0x120   :  { %442 = vmatpush1.msra.mxu0 %v1786_v6  ;;  %513 = vmatpush1.msra.mxu1 %v1856_v18 }
 0x121   :  { %443 = vmatprep.subr.mxu0 %v1792_v7  ;;  %514 = vmatprep.subr.mxu1 %v1861_v19 }
 0x122   :  { %444 = vmatpush1.msra.mxu0 %v1798_v8  ;;  %515 = vmatpush1.msra.mxu1 %v1873_v21 }
 0x123   :  { %445 = vmatprep.subr.mxu0 %v1809_v10  ;;  %516 = vmatprep.subr.mxu1 %v1885_v23 }
 0x124   :  { %446 = vmatpush1.msra.mxu0 %v1821_v12  ;;  %517 = vmatpush1.msra.mxu1 %v1897_v25 }
 0x125   :  { %447 = vmatprep.subr.mxu0 %v1838_v15  ;;  %518 = vmatprep.subr.mxu1 %v1909_v27 }
 0x126   :  { %448 = vmatpush1.msra.mxu0 %v1850_v17  ;;  %519 = vmatpush1.msra.mxu1 %v1921_v29 }
 0x127   :  { %449 = vmatprep.subr.mxu0 %v1867_v20  ;;  %520 = vmatprep.subr.mxu1 %v1933_v31 }
 0x128   :  { %450 = vmatpush1.msra.mxu0 %v1879_v22  ;;  %521 = vmatpush1.msra.mxu1 %v1945_v33 }
 0x129   :  { %451 = vmatprep.subr.mxu0 %v1891_v24  ;;  %522 = vmatprep.subr.mxu1 %v1957_v35 }
 0x12a   :  { %452 = vmatpush1.msra.mxu0 %v1903_v26  ;;  %523 = vmatpush1.msra.mxu1 %v1969_v37 }
 0x12b   :  { %453 = vmatprep.subr.mxu0 %v1915_v28  ;;  %524 = vmatprep.subr.mxu1 %v1981_v39 }
 0x12c   :  { %454 = vmatpush1.msra.mxu0 %v1927_v30  ;;  %525 = vmatpush1.msra.mxu1 %v1993_v41 }
 0x12d   :  { %455 = vmatprep.subr.mxu0 %v1939_v32  ;;  %526 = vmatprep.subr.mxu1 %v2005_v43 }
 0x12e   :  { %456 = vmatpush1.msra.mxu0 %v1951_v34  ;;  %527 = vmatpush1.msra.mxu1 %v2017_v45 }
 0x12f   :  { %457 = vmatprep.subr.mxu0 %v1963_v36  ;;  %528 = vmatprep.subr.mxu1 %v2029_v47 }
 0x130   :  { %458 = vmatpush1.msra.mxu0 %v1975_v38  ;;  %529 = vmatpush1.msra.mxu1 %v2041_v49 }
 0x131   :  { %459 = vmatprep.subr.mxu0 %v1987_v40  ;;  %530 = vmatprep.subr.mxu1 %v2053_v51 }
 0x132   :  { %460 = vmatpush1.msra.mxu0 %v1999_v42  ;;  %531 = vmatpush1.msra.mxu1 %v3134_v44 }
 0x133   :  { %461 = vmatprep.subr.mxu0 %v3135_v46  ;;  %532 = vmatprep.subr.mxu1 %v3136_v55 }
 0x134   :  { %462 = vmatpush1.msra.mxu0 %v3137_v57  ;;  %533 = vmatpush1.msra.mxu1 %v3138_v58 }
 0x135   :  { %463 = vmatprep.subr.mxu0 %v3139_v59  ;;  %534 = vmatprep.subr.mxu1 %v3140_v60  ;;  %v1497_v59 = vld [vmem:[%s3047_s0 + $0x30] sm:$0xff] }
 0x136   :  { %464 = vmatpush1.msra.mxu0 %v3141_v54  ;;  %535 = vmatpush1.msra.mxu1 %v3142_v56  ;;  %v3152_v56 = vld [vmem:[#allocation4_spill] sm:$0xff] }
 0x137   :  { %465 = vmatprep.subr.mxu0 %v3143_v3  ;;  %536 = vmatprep.subr.mxu1 %v3144_v52  ;;  %v3153_v3 = vld [vmem:[#allocation5_spill] sm:$0xff] }
 0x138   :  { %466 = vmatpush1.msra.mxu0 %v3145_v48  ;;  %537 = vmatpush1.msra.mxu1 %v3146_v61  ;;  %v1495_v61 = vld [vmem:[%s3047_s0 + $0x20] sm:$0xff] }
 0x139   :  { %467 = vmatprep.subr.mxu0 %v3147_v62  ;;  %538 = vmatprep.subr.mxu1 %v3148_v63  ;;  %v1496_v63 = vld [vmem:[%s3047_s0 + $0x28] sm:$0xff] }
 0x13a   :  { %468 = vmatpush1.msra.mxu0 %v3149_v0  ;;  %501 = vmatprep.mubr.f32.mxu0 %v3150_v9 }
 0x13b   :  { %539 = vmatpush1.msra.mxu1 %v3151_v50  ;;  %572 = vmatprep.mubr.f32.mxu1 %v3150_v9 }
 0x13c   :  { %612 = vmatprep.subr.mxu0 %v3152_v56  ;;  %683 = vmatprep.subr.mxu1 %v3153_v3  ;;  %v1498_v3 = vld [vmem:[%s3047_s0 + $0x38] sm:$0xff] }
 0x1db   :  { %v328_v48 = vpop.f32.mrf.mxu0  ;;  %v399_v50 = vpop.f32.mrf.mxu1 }
 0x1dc   :  { %v404_v0 = vadd.f32 %v1495_v61, %v328_v48  ;;  %v406_v48 = vadd.f32 %v1497_v59, %v399_v50  ;;  %v3157_v50 = vld [vmem:[#allocation15_spill] sm:$0xff] }
 0x1dd   :  { %v330_v62 = vpop.f32.mrf.mxu0  ;;  %v401_v56 = vpop.f32.mrf.mxu1 }
 0x1de   :  { %v1499_v52 = vmul.f32 -1.442695, %v404_v0  ;;  %v405_v54 = vadd.f32 %v1496_v63, %v330_v62  ;;  %v407_v60 = vadd.f32 %v1498_v3, %v401_v56 }
 0x1e0   :  { %1561 = vpow2.f32 %v1499_v52  ;;  %v1500_v9 = vmul.f32 -1.442695, %v405_v54  ;;  %v1501_v58 = vmul.f32 -1.442695, %v407_v60  ;;  %v3156_v60 = vld [vmem:[#allocation7_spill] sm:$0xff] }
 0x1e2   :  { %1563 = vpow2.f32 %v1500_v9 }
 0x1e3   :  { %1565 = vpow2.f32 %v1501_v58 }
 0x1ed   :  { %v1562_v57 = vpop.eup %1561 }
 0x1ee   :  { %v411_v61 = vadd.f32 1.0, %v1562_v57 }
 0x1ef   :  { %v1564_v0 = vpop.eup %1563 }
 0x1f0   :  { %1567 = vrcp.f32 %v411_v61  ;;  %v417_v52 = vadd.f32 1.0, %v1564_v0  ;;  %v1566_v54 = vpop.eup %1565  ;;  %v3159_v61 = vld [vmem:[#allocation17_spill] sm:$0xff] }
 0x1f1   :  { %1569 = vtanh.f32 %v406_v48  ;;  %v424_v55 = vadd.f32 1.0, %v1566_v54  ;;  %v3158_v48 = vld [vmem:[#allocation8_spill] sm:$0xff]  ;;  %v3160_v0 = vld [vmem:[#allocation9_spill] sm:$0xff]  ;;  %v3162_v54 = vld [vmem:[#allocation10_spill] sm:$0xff] }
 0x1f2   :  { %1571 = vrcp.f32 %v417_v52  ;;  %v3161_v52 = vld [vmem:[#allocation18_spill] sm:$0xff] }
 0x1f3   :  { %1573 = vrcp.f32 %v424_v55  ;;  %v3155_v55 = vld [vmem:[#allocation13_spill] sm:$0xff] }
 0x1fd   :  { %v1568_v62 = vpop.eup %1567 }
 0x1fe   :  { %v1570_v63 = vpop.eup %1569 }
 0x1ff   :  { %v1572_v9 = vpop.eup %1571  ;;  %v428_v56 = vmul.f32 %v1570_v63, %v1568_v62  ;;  %v3163_v62 = vld [vmem:[#allocation19_spill] sm:$0xff]  ;;  %v3164_v63 = vld [vmem:[#allocation12_spill] sm:$0xff] }
 0x200   :  { %v427_v3 = vmul.f32 %v1572_v9, %v2221_v53  ;;  %v1574_v57 = vpop.eup %1573  ;;  %v3154_v53 = vld [vmem:[#allocation6_spill] sm:$0xff]  ;;  %v3165_v9 = vld [vmem:[#allocation20_spill] sm:$0xff] }
 0x202   :  { %v2303_v46 = vadd.f32 %v428_v56, %v427_v3  ;;  %v3166_v56 = vld [vmem:[#allocation14_spill] sm:$0xff]  ;;  %v3167_v3 = vld [vmem:[#allocation21_spill] sm:$0xff] }
 0x204   :  { %1575 = vtanh.f32 %v2303_v46 }
 0x211   :  { %v1576_v59 = vpop.eup %1575 }
 0x212   :  { %v431_v58 = vmul.f32 %v1576_v59, %v1574_v57  ;;  %v3168_v57 = vld [vmem:[#allocation16_spill] sm:$0xff]  ;;  %v3169_v59 = vmov 0.0  }
 0x214   :  { %502 = vmatmul.mubr.f32.vlgmr.msra.gmra.mxu0 %v431_v58  ;;  %573 = vmatmul.mubr.f32.vlgmr.msra.gmra.mxu1 %v431_v58  ;;  %v3170_v58 = vld [vmem:[#allocation22_spill] sm:$0xff] }
 0x215   :  { %613 = vmatpush1.msra.mxu0 %v1761_v1  ;;  %684 = vmatpush1.msra.mxu1 %v1815_v11 }
 0x216   :  { %614 = vmatprep.subr.mxu0 %v1766_v2  ;;  %685 = vmatprep.subr.mxu1 %v1827_v13 }
 0x217   :  { %615 = vmatpush1.msra.mxu0 %v1774_v4  ;;  %686 = vmatpush1.msra.mxu1 %v1832_v14 }
 0x218   :  { %616 = vmatprep.subr.mxu0 %v1780_v5  ;;  %687 = vmatprep.subr.mxu1 %v1844_v16 }
 0x219   :  { %617 = vmatpush1.msra.mxu0 %v1786_v6  ;;  %688 = vmatpush1.msra.mxu1 %v1856_v18 }
 0x21a   :  { %618 = vmatprep.subr.mxu0 %v1792_v7  ;;  %689 = vmatprep.subr.mxu1 %v1861_v19 }
 0x21b   :  { %619 = vmatpush1.msra.mxu0 %v1798_v8  ;;  %690 = vmatpush1.msra.mxu1 %v1873_v21 }
 0x21c   :  { %620 = vmatprep.subr.mxu0 %v1809_v10  ;;  %691 = vmatprep.subr.mxu1 %v1885_v23 }
 0x21d   :  { %621 = vmatpush1.msra.mxu0 %v1821_v12  ;;  %692 = vmatpush1.msra.mxu1 %v1897_v25 }
 0x21e   :  { %622 = vmatprep.subr.mxu0 %v1838_v15  ;;  %693 = vmatprep.subr.mxu1 %v1909_v27 }
 0x21f   :  { %623 = vmatpush1.msra.mxu0 %v1850_v17  ;;  %694 = vmatpush1.msra.mxu1 %v1921_v29 }
 0x220   :  { %624 = vmatprep.subr.mxu0 %v1867_v20  ;;  %695 = vmatprep.subr.mxu1 %v1933_v31 }
 0x221   :  { %625 = vmatpush1.msra.mxu0 %v1879_v22  ;;  %696 = vmatpush1.msra.mxu1 %v1945_v33 }
 0x222   :  { %626 = vmatprep.subr.mxu0 %v1891_v24  ;;  %697 = vmatprep.subr.mxu1 %v1957_v35 }
 0x223   :  { %627 = vmatpush1.msra.mxu0 %v1903_v26  ;;  %698 = vmatpush1.msra.mxu1 %v1969_v37 }
 0x224   :  { %628 = vmatprep.subr.mxu0 %v1915_v28  ;;  %699 = vmatprep.subr.mxu1 %v1981_v39 }
 0x225   :  { %629 = vmatpush1.msra.mxu0 %v1927_v30  ;;  %700 = vmatpush1.msra.mxu1 %v1993_v41 }
 0x226   :  { %630 = vmatprep.subr.mxu0 %v1939_v32  ;;  %701 = vmatprep.subr.mxu1 %v2005_v43 }
 0x227   :  { %631 = vmatpush1.msra.mxu0 %v1951_v34  ;;  %702 = vmatpush1.msra.mxu1 %v2017_v45 }
 0x228   :  { %632 = vmatprep.subr.mxu0 %v1963_v36  ;;  %703 = vmatprep.subr.mxu1 %v2029_v47 }
 0x229   :  { %633 = vmatpush1.msra.mxu0 %v1975_v38  ;;  %704 = vmatpush1.msra.mxu1 %v2041_v49 }
 0x22a   :  { %634 = vmatprep.subr.mxu0 %v1987_v40  ;;  %705 = vmatprep.subr.mxu1 %v2053_v51 }
 0x22b   :  { %635 = vmatpush1.msra.mxu0 %v1999_v42  ;;  %706 = vmatpush1.msra.mxu1 %v3134_v44 }
 0x22c   :  { %636 = vmatprep.subr.mxu0 %v3154_v53  ;;  %707 = vmatprep.subr.mxu1 %v3155_v55 }
 0x22d   :  { %637 = vmatpush1.msra.mxu0 %v3156_v60  ;;  %708 = vmatpush1.msra.mxu1 %v3157_v50 }
 0x22e   :  { %638 = vmatprep.subr.mxu0 %v3158_v48  ;;  %709 = vmatprep.subr.mxu1 %v3159_v61  ;;  %v1504_v48 = vld [vmem:[%s3047_s0 + $0x50] sm:$0xff] }
 0x22f   :  { %639 = vmatpush1.msra.mxu0 %v3160_v0  ;;  %710 = vmatpush1.msra.mxu1 %v3161_v52  ;;  %v3171_v52 = vld [vmem:[#allocation4_spill] sm:$0xff] }
 0x230   :  { %640 = vmatprep.subr.mxu0 %v3162_v54  ;;  %711 = vmatprep.subr.mxu1 %v3163_v62  ;;  %v3172_v54 = vld [vmem:[#allocation5_spill] sm:$0xff] }
 0x231   :  { %641 = vmatpush1.msra.mxu0 %v3164_v63  ;;  %712 = vmatpush1.msra.mxu1 %v3165_v9  ;;  %v1502_v9 = vld [vmem:[%s3047_s0 + $0x40] sm:$0xff] }
 0x232   :  { %642 = vmatprep.subr.mxu0 %v3166_v56  ;;  %713 = vmatprep.subr.mxu1 %v3167_v3  ;;  %v1503_v3 = vld [vmem:[%s3047_s0 + $0x48] sm:$0xff] }
 0x233   :  { %643 = vmatpush1.msra.mxu0 %v3168_v57  ;;  %676 = vmatprep.mubr.f32.mxu0 %v3169_v59 }
 0x234   :  { %714 = vmatpush1.msra.mxu1 %v3170_v58  ;;  %747 = vmatprep.mubr.f32.mxu1 %v3169_v59 }
 0x235   :  { %787 = vmatprep.subr.mxu0 %v3171_v52  ;;  %858 = vmatprep.subr.mxu1 %v3172_v54  ;;  %v1505_v52 = vld [vmem:[%s3047_s0 + $0x58] sm:$0xff] }
 0x2d4   :  { %v503_v63 = vpop.f32.mrf.mxu0  ;;  %v574_v58 = vpop.f32.mrf.mxu1 }
 0x2d5   :  { %v579_v57 = vadd.f32 %v1502_v9, %v503_v63  ;;  %v581_v63 = vadd.f32 %v1504_v48, %v574_v58 }
 0x2d6   :  { %v505_v56 = vpop.f32.mrf.mxu0  ;;  %v576_v54 = vpop.f32.mrf.mxu1 }
 0x2d7   :  { %v1506_v62 = vmul.f32 -1.442695, %v579_v57  ;;  %v580_v0 = vadd.f32 %v1503_v3, %v505_v56  ;;  %v582_v61 = vadd.f32 %v1505_v52, %v576_v54 }
 0x2d9   :  { %1577 = vpow2.f32 %v1506_v62  ;;  %v1507_v59 = vmul.f32 -1.442695, %v580_v0  ;;  %v1508_v50 = vmul.f32 -1.442695, %v582_v61 }
 0x2db   :  { %1579 = vpow2.f32 %v1507_v59 }
 0x2dc   :  { %1581 = vpow2.f32 %v1508_v50 }
 0x2e6   :  { %v1578_v60 = vpop.eup %1577 }
 0x2e7   :  { %v586_v9 = vadd.f32 1.0, %v1578_v60 }
 0x2e8   :  { %v1580_v57 = vpop.eup %1579 }
 0x2e9   :  { %1583 = vrcp.f32 %v586_v9  ;;  %v592_v62 = vadd.f32 1.0, %v1580_v57  ;;  %v1582_v0 = vpop.eup %1581 }
 0x2ea   :  { %1585 = vtanh.f32 %v581_v63  ;;  %v599_v55 = vadd.f32 1.0, %v1582_v0  ;;  %v2478_v0 = vld [vmem:[%s3046_s1 + $0x1e0] sm:$0xff] }
 0x2eb   :  { %1587 = vrcp.f32 %v592_v62 }
 0x2ec   :  { %1589 = vrcp.f32 %v599_v55 }
 0x2f6   :  { %v1584_v56 = vpop.eup %1583 }
 0x2f7   :  { %v1586_v3 = vpop.eup %1585 }
 0x2f8   :  { %v1588_v59 = vpop.eup %1587  ;;  %v603_v54 = vmul.f32 %v1586_v3, %v1584_v56  ;;  %v2490_v56 = vld [vmem:[%s3046_s1 + $0x1c8] sm:$0xff]  ;;  %v2496_v3 = vld [vmem:[%s3046_s1 + $0x1d8] sm:$0xff] }
 0x2f9   :  { %v602_v52 = vmul.f32 %v1588_v59, %v2303_v46  ;;  %v1590_v60 = vpop.eup %1589  ;;  %v2502_v59 = vld [vmem:[%s3046_s1 + $0x1c0] sm:$0xff] }
 0x2fb   :  { %v2385_v53 = vadd.f32 %v603_v54, %v602_v52  ;;  %v2508_v54 = vld [vmem:[%s3046_s1 + $0x1d0] sm:$0xff]  ;;  %v2514_v52 = vld [vmem:[%s3046_s1 + $0x1a8] sm:$0xff] }
 0x2fd   :  { %1591 = vtanh.f32 %v2385_v53 }
 0x30a   :  { %v1592_v48 = vpop.eup %1591 }
 0x30b   :  { %v606_v50 = vmul.f32 %v1592_v48, %v1590_v60  ;;  %v2520_v60 = vld [vmem:[%s3046_s1 + $0x1b8] sm:$0xff]  ;;  %v2526_v48 = vld [vmem:[%s3046_s1 + $0x1a0] sm:$0xff] }
 0x30d   :  { %677 = vmatmul.mubr.f32.vlgmr.msra.gmra.mxu0 %v606_v50  ;;  %748 = vmatmul.mubr.f32.vlgmr.msra.gmra.mxu1 %v606_v50  ;;  %v2532_v50 = vld [vmem:[%s3046_s1 + $0x1b0] sm:$0xff] }
 0x30e   :  { %788 = vmatpush1.msra.mxu0 %v1761_v1  ;;  %859 = vmatpush1.msra.mxu1 %v1815_v11  ;;  %v3173_v1 = vld [vmem:[#allocation6_spill] sm:$0xff] }
 0x30f   :  { %789 = vmatprep.subr.mxu0 %v1766_v2  ;;  %860 = vmatprep.subr.mxu1 %v1827_v13  ;;  %v3174_v2 = vld [vmem:[#allocation13_spill] sm:$0xff]  ;;  %v3181_v11 = vld [vmem:[#allocation10_spill] sm:$0xff]  ;;  %v3183_v13 = vld [vmem:[#allocation12_spill] sm:$0xff] }
 0x310   :  { %790 = vmatpush1.msra.mxu0 %v1774_v4  ;;  %861 = vmatpush1.msra.mxu1 %v1832_v14  ;;  %v3175_v4 = vld [vmem:[#allocation7_spill] sm:$0xff]  ;;  %v3184_v14 = vld [vmem:[#allocation20_spill] sm:$0xff] }
 0x311   :  { %791 = vmatprep.subr.mxu0 %v1780_v5  ;;  %862 = vmatprep.subr.mxu1 %v1844_v16  ;;  %v3176_v5 = vld [vmem:[#allocation15_spill] sm:$0xff]  ;;  %v3186_v16 = vld [vmem:[#allocation21_spill] sm:$0xff] }
 0x312   :  { %792 = vmatpush1.msra.mxu0 %v1786_v6  ;;  %863 = vmatpush1.msra.mxu1 %v1856_v18  ;;  %v3177_v6 = vld [vmem:[#allocation8_spill] sm:$0xff]  ;;  %v3188_v18 = vmov 0.0  }
 0x313   :  { %793 = vmatprep.subr.mxu0 %v1792_v7  ;;  %864 = vmatprep.subr.mxu1 %v1861_v19  ;;  %v3178_v7 = vld [vmem:[#allocation17_spill] sm:$0xff]  ;;  %v3189_v19 = vld [vmem:[#allocation22_spill] sm:$0xff] }
 0x314   :  { %794 = vmatpush1.msra.mxu0 %v1798_v8  ;;  %865 = vmatpush1.msra.mxu1 %v1873_v21  ;;  %v3179_v8 = vld [vmem:[#allocation9_spill] sm:$0xff] }
 0x315   :  { %795 = vmatprep.subr.mxu0 %v1809_v10  ;;  %866 = vmatprep.subr.mxu1 %v1885_v23  ;;  %v3180_v10 = vld [vmem:[#allocation18_spill] sm:$0xff]  ;;  %v3191_v21 = vld [vmem:[#allocation5_spill] sm:$0xff] }
 0x316   :  { %796 = vmatpush1.msra.mxu0 %v1821_v12  ;;  %867 = vmatpush1.msra.mxu1 %v1897_v25  ;;  %v3182_v12 = vld [vmem:[#allocation19_spill] sm:$0xff] }
 0x317   :  { %797 = vmatprep.subr.mxu0 %v1838_v15  ;;  %868 = vmatprep.subr.mxu1 %v1909_v27  ;;  %v3185_v15 = vld [vmem:[#allocation14_spill] sm:$0xff] }
 0x318   :  { %798 = vmatpush1.msra.mxu0 %v1850_v17  ;;  %869 = vmatpush1.msra.mxu1 %v1921_v29  ;;  %v3187_v17 = vld [vmem:[#allocation16_spill] sm:$0xff] }
 0x319   :  { %799 = vmatprep.subr.mxu0 %v1867_v20  ;;  %870 = vmatprep.subr.mxu1 %v1933_v31  ;;  %v2455_v20 = vld [vmem:[%s3046_s1 + $0x1e8] sm:$0xff]  ;;  %v1512_v31 = vld [vmem:[%s3047_s0 + $0x78] sm:$0xff] }
 0x31a   :  { %800 = vmatpush1.msra.mxu0 %v1879_v22  ;;  %871 = vmatpush1.msra.mxu1 %v1945_v33  ;;  %3190 = vst [vmem:[#allocation11_spill] sm:$0xff] %v2455_v20  ;;  %v1509_v22 = vld [vmem:[%s3047_s0 + $0x60] sm:$0xff] }
 0x31b   :  { %801 = vmatprep.subr.mxu0 %v1891_v24  ;;  %872 = vmatprep.subr.mxu1 %v1957_v35  ;;  %v1510_v24 = vld [vmem:[%s3047_s0 + $0x68] sm:$0xff] }
 0x31c   :  { %802 = vmatpush1.msra.mxu0 %v1903_v26  ;;  %873 = vmatpush1.msra.mxu1 %v1969_v37 }
 0x31d   :  { %803 = vmatprep.subr.mxu0 %v1915_v28  ;;  %874 = vmatprep.subr.mxu1 %v1981_v39 }
 0x31e   :  { %804 = vmatpush1.msra.mxu0 %v1927_v30  ;;  %875 = vmatpush1.msra.mxu1 %v1993_v41 }
 0x31f   :  { %805 = vmatprep.subr.mxu0 %v1939_v32  ;;  %876 = vmatprep.subr.mxu1 %v2005_v43 }
 0x320   :  { %806 = vmatpush1.msra.mxu0 %v1951_v34  ;;  %877 = vmatpush1.msra.mxu1 %v2017_v45  ;;  %v1511_v34 = vld [vmem:[%s3047_s0 + $0x70] sm:$0xff] }
 0x321   :  { %807 = vmatprep.subr.mxu0 %v1963_v36  ;;  %878 = vmatprep.subr.mxu1 %v2029_v47 }
 0x322   :  { %808 = vmatpush1.msra.mxu0 %v1975_v38  ;;  %879 = vmatpush1.msra.mxu1 %v2041_v49 }
 0x323   :  { %809 = vmatprep.subr.mxu0 %v1987_v40  ;;  %880 = vmatprep.subr.mxu1 %v2053_v51 }
 0x324   :  { %810 = vmatpush1.msra.mxu0 %v1999_v42  ;;  %881 = vmatpush1.msra.mxu1 %v3134_v44 }
 0x325   :  { %811 = vmatprep.subr.mxu0 %v3173_v1  ;;  %882 = vmatprep.subr.mxu1 %v3174_v2  ;;  %v2538_v1 = vld [vmem:[%s3046_s1 + $0x188] sm:$0xff] }
 0x326   :  { %812 = vmatpush1.msra.mxu0 %v3175_v4  ;;  %883 = vmatpush1.msra.mxu1 %v3176_v5  ;;  %v2544_v4 = vld [vmem:[%s3046_s1 + $0x198] sm:$0xff] }
 0x327   :  { %813 = vmatprep.subr.mxu0 %v3177_v6  ;;  %884 = vmatprep.subr.mxu1 %v3178_v7  ;;  %v2550_v6 = vld [vmem:[%s3046_s1 + $0x180] sm:$0xff] }
 0x328   :  { %814 = vmatpush1.msra.mxu0 %v3179_v8  ;;  %885 = vmatpush1.msra.mxu1 %v3180_v10  ;;  %v2556_v8 = vld [vmem:[%s3046_s1 + $0x190] sm:$0xff] }
 0x329   :  { %815 = vmatprep.subr.mxu0 %v3181_v11  ;;  %886 = vmatprep.subr.mxu1 %v3182_v12  ;;  %v2562_v11 = vld [vmem:[%s3046_s1 + $0x168] sm:$0xff] }
 0x32a   :  { %816 = vmatpush1.msra.mxu0 %v3183_v13  ;;  %887 = vmatpush1.msra.mxu1 %v3184_v14  ;;  %v2568_v13 = vld [vmem:[%s3046_s1 + $0x178] sm:$0xff] }
 0x32b   :  { %817 = vmatprep.subr.mxu0 %v3185_v15  ;;  %888 = vmatprep.subr.mxu1 %v3186_v16 }
 0x32c   :  { %818 = vmatpush1.msra.mxu0 %v3187_v17  ;;  %851 = vmatprep.mubr.f32.mxu0 %v3188_v18 }
 0x32d   :  { %889 = vmatpush1.msra.mxu1 %v3189_v19  ;;  %922 = vmatprep.mubr.f32.mxu1 %v3188_v18 }
 0x32e   :  { %962 = vmatprep.subr.mxu0 %v2455_v20  ;;  %1033 = vmatprep.subr.mxu1 %v3191_v21  ;;  %v2574_v21 = vld [vmem:[%s3046_s1 + $0x160] sm:$0xff] }
 0x3cd   :  { %v678_v23 = vpop.f32.mrf.mxu0  ;;  %v749_v29 = vpop.f32.mrf.mxu1 }
 0x3ce   :  { %v754_v25 = vadd.f32 %v1509_v22, %v678_v23  ;;  %v756_v37 = vadd.f32 %v1511_v34, %v749_v29  ;;  %v2580_v22 = vld [vmem:[%s3046_s1 + $0x170] sm:$0xff]  ;;  %v2586_v23 = vld [vmem:[%s3046_s1 + $0x148] sm:$0xff]  ;;  %v2622_v29 = vld [vmem:[%s3046_s1 + $0x120] sm:$0xff] }
 0x3cf   :  { %v680_v26 = vpop.f32.mrf.mxu0  ;;  %v751_v32 = vpop.f32.mrf.mxu1  ;;  %v2652_v34 = vld [vmem:[%s3046_s1 + $0x110] sm:$0xff] }
 0x3d0   :  { %v1513_v27 = vmul.f32 -1.442695, %v754_v25  ;;  %v755_v28 = vadd.f32 %v1510_v24, %v680_v26  ;;  %v757_v33 = vadd.f32 %v1512_v31, %v751_v32  ;;  %v2592_v24 = vld [vmem:[%s3046_s1 + $0x158] sm:$0xff]  ;;  %v2598_v25 = vld [vmem:[%s3046_s1 + $0x140] sm:$0xff]  ;;  %v2604_v26 = vld [vmem:[%s3046_s1 + $0x150] sm:$0xff] }
 0x3d1   :  { %v2634_v31 = vld [vmem:[%s3046_s1 + $0x108] sm:$0xff]  ;;  %v2640_v32 = vld [vmem:[%s3046_s1 + $0x118] sm:$0xff] }
 0x3d2   :  { %1593 = vpow2.f32 %v1513_v27  ;;  %v1514_v30 = vmul.f32 -1.442695, %v755_v28  ;;  %v1515_v35 = vmul.f32 -1.442695, %v757_v33  ;;  %v2610_v27 = vld [vmem:[%s3046_s1 + $0x128] sm:$0xff]  ;;  %v2616_v28 = vld [vmem:[%s3046_s1 + $0x138] sm:$0xff] }
 0x3d3   :  { %v2646_v33 = vld [vmem:[%s3046_s1 + $0x100] sm:$0xff] }
 0x3d4   :  { %1595 = vpow2.f32 %v1514_v30  ;;  %v2628_v30 = vld [vmem:[%s3046_s1 + $0x130] sm:$0xff] }
 0x3d5   :  { %1597 = vpow2.f32 %v1515_v35  ;;  %v2658_v35 = vld [vmem:[%s3046_s1 + $0xe8] sm:$0xff] }
 0x3df   :  { %v1594_v36 = vpop.eup %1593 }
 0x3e0   :  { %v761_v38 = vadd.f32 1.0, %v1594_v36  ;;  %v2664_v36 = vld [vmem:[%s3046_s1 + $0xf8] sm:$0xff] }
 0x3e1   :  { %v1596_v39 = vpop.eup %1595 }
 0x3e2   :  { %1599 = vrcp.f32 %v761_v38  ;;  %v767_v40 = vadd.f32 1.0, %v1596_v39  ;;  %v1598_v41 = vpop.eup %1597  ;;  %v2676_v38 = vld [vmem:[%s3046_s1 + $0xf0] sm:$0xff]  ;;  %v2682_v39 = vld [vmem:[%s3046_s1 + $0xc8] sm:$0xff] }
 0x3e3   :  { %1601 = vtanh.f32 %v756_v37  ;;  %v774_v55 = vadd.f32 1.0, %v1598_v41  ;;  %v2670_v37 = vld [vmem:[%s3046_s1 + $0xe0] sm:$0xff] }
 0x3e4   :  { %1603 = vrcp.f32 %v767_v40  ;;  %v2688_v40 = vld [vmem:[%s3046_s1 + $0xd8] sm:$0xff]  ;;  %v2694_v41 = vld [vmem:[%s3046_s1 + $0xc0] sm:$0xff] }
 0x3e5   :  { %1605 = vrcp.f32 %v774_v55 }
 0x3ef   :  { %v1600_v42 = vpop.eup %1599 }
 0x3f0   :  { %v1602_v43 = vpop.eup %1601 }
 0x3f1   :  { %v1604_v46 = vpop.eup %1603  ;;  %v778_v61 = vmul.f32 %v1602_v43, %v1600_v42  ;;  %v2701_v42 = vld [vmem:[%s3046_s1 + $0xa8] sm:$0xff]  ;;  %v2708_v43 = vld [vmem:[%s3046_s1 + $0xa0] sm:$0xff] }
 0x3f2   :  { %v777_v58 = vmul.f32 %v1604_v46, %v2385_v53  ;;  %v1606_v9 = vpop.eup %1605  ;;  %v2484_v53 = vld [vmem:[%s3046_s1 + $0x1f0] sm:$0xff] }
 0x3f4   :  { %v2472_v63 = vadd.f32 %v778_v61, %v777_v58  ;;  %v1519_v58 = vld [vmem:[%s3047_s0 + $0x98] sm:$0xff] }
 0x3f6   :  { %1607 = vtanh.f32 %v2472_v63 }
 0x403   :  { %v1608_v57 = vpop.eup %1607 }
 0x404   :  { %v781_v62 = vmul.f32 %v1608_v57, %v1606_v9 }
 0x406   :  { %852 = vmatmul.mubr.f32.vlgmr.msra.gmra.mxu0 %v781_v62  ;;  %923 = vmatmul.mubr.f32.vlgmr.msra.gmra.mxu1 %v781_v62  ;;  %v1518_v62 = vld [vmem:[%s3047_s0 + $0x90] sm:$0xff] }
 0x407   :  { %963 = vmatpush1.msra.mxu0 %v2478_v0  ;;  %1034 = vmatpush1.msra.mxu1 %v2484_v53 }
 0x408   :  { %964 = vmatprep.subr.mxu0 %v2490_v56  ;;  %1035 = vmatprep.subr.mxu1 %v2496_v3 }
 0x409   :  { %965 = vmatpush1.msra.mxu0 %v2502_v59  ;;  %1036 = vmatpush1.msra.mxu1 %v2508_v54 }
 0x40a   :  { %966 = vmatprep.subr.mxu0 %v2514_v52  ;;  %1037 = vmatprep.subr.mxu1 %v2520_v60 }
 0x40b   :  { %967 = vmatpush1.msra.mxu0 %v2526_v48  ;;  %1038 = vmatpush1.msra.mxu1 %v2532_v50 }
 0x40c   :  { %968 = vmatprep.subr.mxu0 %v2538_v1  ;;  %1039 = vmatprep.subr.mxu1 %v2544_v4 }
 0x40d   :  { %969 = vmatpush1.msra.mxu0 %v2550_v6  ;;  %1040 = vmatpush1.msra.mxu1 %v2556_v8 }
 0x40e   :  { %970 = vmatprep.subr.mxu0 %v2562_v11  ;;  %1041 = vmatprep.subr.mxu1 %v2568_v13 }
 0x40f   :  { %971 = vmatpush1.msra.mxu0 %v2574_v21  ;;  %1042 = vmatpush1.msra.mxu1 %v2580_v22 }
 0x410   :  { %972 = vmatprep.subr.mxu0 %v2586_v23  ;;  %1043 = vmatprep.subr.mxu1 %v2592_v24 }
 0x411   :  { %973 = vmatpush1.msra.mxu0 %v2598_v25  ;;  %1044 = vmatpush1.msra.mxu1 %v2604_v26 }
 0x412   :  { %974 = vmatprep.subr.mxu0 %v2610_v27  ;;  %1045 = vmatprep.subr.mxu1 %v2616_v28 }
 0x413   :  { %975 = vmatpush1.msra.mxu0 %v2622_v29  ;;  %1046 = vmatpush1.msra.mxu1 %v2628_v30 }
 0x414   :  { %976 = vmatprep.subr.mxu0 %v2634_v31  ;;  %1047 = vmatprep.subr.mxu1 %v2640_v32 }
 0x415   :  { %977 = vmatpush1.msra.mxu0 %v2646_v33  ;;  %1048 = vmatpush1.msra.mxu1 %v2652_v34 }
 0x416   :  { %978 = vmatprep.subr.mxu0 %v2658_v35  ;;  %1049 = vmatprep.subr.mxu1 %v2664_v36 }
 0x417   :  { %979 = vmatpush1.msra.mxu0 %v2670_v37  ;;  %1050 = vmatpush1.msra.mxu1 %v2676_v38 }
 0x418   :  { %980 = vmatprep.subr.mxu0 %v2682_v39  ;;  %1051 = vmatprep.subr.mxu1 %v2688_v40 }
 0x419   :  { %981 = vmatpush1.msra.mxu0 %v2694_v41  ;;  %1052 = vmatpush1.msra.mxu1 %v2017_v45  ;;  %v2715_v45 = vld [vmem:[%s3046_s1 + $0x88] sm:$0xff] }
 0x41a   :  { %982 = vmatprep.subr.mxu0 %v2701_v42  ;;  %1053 = vmatprep.subr.mxu1 %v2029_v47  ;;  %v2722_v47 = vld [vmem:[%s3046_s1 + $0x80] sm:$0xff] }
 0x41b   :  { %983 = vmatpush1.msra.mxu0 %v2708_v43  ;;  %1054 = vmatpush1.msra.mxu1 %v2041_v49  ;;  %v2729_v49 = vld [vmem:[%s3046_s1 + $0x68] sm:$0xff] }
 0x41c   :  { %984 = vmatprep.subr.mxu0 %v2715_v45  ;;  %1055 = vmatprep.subr.mxu1 %v2053_v51  ;;  %3192 = vst [vmem:[#allocation4_spill] sm:$0xff] %v2729_v49  ;;  %v2736_v51 = vld [vmem:[%s3046_s1 + $0x60] sm:$0xff] }
 0x41d   :  { %985 = vmatpush1.msra.mxu0 %v2722_v47  ;;  %1056 = vmatpush1.msra.mxu1 %v3134_v44  ;;  %3193 = vst [vmem:[#allocation6_spill] sm:$0xff] %v2736_v51  ;;  %v2743_v44 = vld [vmem:[%s3046_s1 + $0x48] sm:$0xff] }
 0x41e   :  { %986 = vmatprep.subr.mxu0 %v2729_v49  ;;  %1057 = vmatprep.subr.mxu1 %v3174_v2  ;;  %3194 = vst [vmem:[#allocation13_spill] sm:$0xff] %v2743_v44  ;;  %v2750_v2 = vld [vmem:[%s3046_s1 + $0x40] sm:$0xff] }
 0x41f   :  { %987 = vmatpush1.msra.mxu0 %v2736_v51  ;;  %1058 = vmatpush1.msra.mxu1 %v3176_v5  ;;  %3195 = vst [vmem:[#allocation7_spill] sm:$0xff] %v2750_v2  ;;  %v2757_v5 = vld [vmem:[%s3046_s1 + $0x28] sm:$0xff] }
 0x420   :  { %988 = vmatprep.subr.mxu0 %v2743_v44  ;;  %1059 = vmatprep.subr.mxu1 %v3178_v7  ;;  %3196 = vst [vmem:[#allocation15_spill] sm:$0xff] %v2757_v5  ;;  %v2764_v7 = vld [vmem:[%s3046_s1 + $0x20] sm:$0xff] }
 0x421   :  { %989 = vmatpush1.msra.mxu0 %v2750_v2  ;;  %1060 = vmatpush1.msra.mxu1 %v3180_v10  ;;  %3197 = vst [vmem:[#allocation8_spill] sm:$0xff] %v2764_v7  ;;  %v2778_v10 = vld [vmem:[%s3046_s1 + $0x1f8] sm:$0xff] }
 0x422   :  { %990 = vmatprep.subr.mxu0 %v2757_v5  ;;  %1061 = vmatprep.subr.mxu1 %v3182_v12  ;;  %3198 = vst [vmem:[#allocation17_spill] sm:$0xff] %v2778_v10  ;;  %v1516_v12 = vld [vmem:[%s3047_s0 + $0x80] sm:$0xff] }
 0x423   :  { %991 = vmatpush1.msra.mxu0 %v2764_v7  ;;  %1062 = vmatpush1.msra.mxu1 %v3184_v14 }
 0x424   :  { %992 = vmatprep.subr.mxu0 %v3185_v15  ;;  %1063 = vmatprep.subr.mxu1 %v3186_v16  ;;  %v1517_v15 = vld [vmem:[%s3047_s0 + $0x88] sm:$0xff] }
 0x425   :  { %993 = vmatpush1.msra.mxu0 %v3187_v17  ;;  %1026 = vmatprep.mubr.f32.mxu0 %v3188_v18 }
 0x426   :  { %1064 = vmatpush1.msra.mxu1 %v3189_v19  ;;  %1097 = vmatprep.mubr.f32.mxu1 %v3188_v18 }
 0x427   :  { %1137 = vmatprep.subr.mxu0 %v2455_v20  ;;  %1208 = vmatprep.subr.mxu1 %v2778_v10 }
 0x4c6   :  { %v853_v14 = vpop.f32.mrf.mxu0  ;;  %v924_v55 = vpop.f32.mrf.mxu1 }
 0x4c7   :  { %v929_v16 = vadd.f32 %v1516_v12, %v853_v14  ;;  %v931_v12 = vadd.f32 %v1518_v62, %v924_v55  ;;  %v2858_v62 = vld [vmem:[%s3046_s1 + $0x98] sm:$0xff] }
 0x4c8   :  { %v855_v17 = vpop.f32.mrf.mxu0  ;;  %v926_v9 = vpop.f32.mrf.mxu1 }
 0x4c9   :  { %v1520_v19 = vmul.f32 -1.442695, %v929_v16  ;;  %v930_v46 = vadd.f32 %v1517_v15, %v855_v17  ;;  %v932_v57 = vadd.f32 %v1519_v58, %v926_v9 }
 0x4cb   :  { %1609 = vpow2.f32 %v1520_v19  ;;  %v1521_v61 = vmul.f32 -1.442695, %v930_v46  ;;  %v1522_v10 = vmul.f32 -1.442695, %v932_v57  ;;  %v2851_v57 = vld [vmem:[%s3046_s1 + $0xb0] sm:$0xff] }
 0x4cd   :  { %1611 = vpow2.f32 %v1521_v61 }
 0x4ce   :  { %1613 = vpow2.f32 %v1522_v10 }
 0x4d8   :  { %v1610_v20 = vpop.eup %1609 }
 0x4d9   :  { %v936_v14 = vadd.f32 1.0, %v1610_v20 }
 0x4da   :  { %v1612_v16 = vpop.eup %1611 }
 0x4db   :  { %1615 = vrcp.f32 %v936_v14  ;;  %v942_v15 = vadd.f32 1.0, %v1612_v16  ;;  %v1614_v17 = vpop.eup %1613  ;;  %v2872_v14 = vld [vmem:[%s3046_s1 + $0x78] sm:$0xff]  ;;  %v2879_v16 = vld [vmem:[%s3046_s1 + $0x70] sm:$0xff] }
 0x4dc   :  { %1617 = vtanh.f32 %v931_v12  ;;  %v949_v18 = vadd.f32 1.0, %v1614_v17  ;;  %v2865_v12 = vld [vmem:[%s3046_s1 + $0x90] sm:$0xff]  ;;  %3199 = vst [vmem:[#allocation9_spill] sm:$0xff] %v2872_v14  ;;  %3200 = vst [vmem:[#allocation18_spill] sm:$0xff] %v2879_v16 }
 0x4dd   :  { %1619 = vrcp.f32 %v942_v15  ;;  %v2886_v15 = vld [vmem:[%s3046_s1 + $0x58] sm:$0xff]  ;;  %v2893_v17 = vld [vmem:[%s3046_s1 + $0x50] sm:$0xff] }
 0x4de   :  { %1621 = vrcp.f32 %v949_v18  ;;  %v2837_v18 = vld [vmem:[%s3046_s1 + $0xd0] sm:$0xff]  ;;  %3201 = vst [vmem:[#allocation10_spill] sm:$0xff] %v2886_v15  ;;  %3202 = vst [vmem:[#allocation19_spill] sm:$0xff] %v2893_v17 }
 0x4e8   :  { %v1616_v19 = vpop.eup %1615 }
 0x4e9   :  { %v1618_v46 = vpop.eup %1617 }
 0x4ea   :  { %v1620_v61 = vpop.eup %1619  ;;  %v953_v58 = vmul.f32 %v1618_v46, %v1616_v19  ;;  %v2900_v19 = vld [vmem:[%s3046_s1 + $0x38] sm:$0xff]  ;;  %v3204_v46 = vld [vmem:[#allocation8_spill] sm:$0xff] }
 0x4eb   :  { %v952_v9 = vmul.f32 %v1620_v61, %v2472_v63  ;;  %v1622_v20 = vpop.eup %1621  ;;  %v2844_v63 = vld [vmem:[%s3046_s1 + $0xb8] sm:$0xff]  ;;  %3203 = vst [vmem:[#allocation12_spill] sm:$0xff] %v2900_v19  ;;  %v2907_v61 = vld [vmem:[%s3046_s1 + $0x30] sm:$0xff] }
 0x4ec   :  { %3205 = vst [vmem:[#allocation20_spill] sm:$0xff] %v2907_v61 }
 0x4ed   :  { %v2794_v7 = vadd.f32 %v953_v58, %v952_v9  ;;  %v2913_v58 = vld [vmem:[%s3046_s1 + $0x8] sm:$0xff]  ;;  %v2919_v9 = vld [vmem:[%s3046_s1 + $0x18] sm:$0xff] }
 0x4ee   :  { %3206 = vst [vmem:[#allocation14_spill] sm:$0xff] %v2913_v58  ;;  %3207 = vst [vmem:[#allocation21_spill] sm:$0xff] %v2919_v9 }
 0x4ef   :  { %1623 = vtanh.f32 %v2794_v7 }
 0x4fc   :  { %v1624_v55 = vpop.eup %1623 }
 0x4fd   :  { %v956_v10 = vmul.f32 %v1624_v55, %v1622_v20  ;;  %v2925_v20 = vld [vmem:[%s3046_s1] sm:$0xff]  ;;  %v3209_v55 = vmov 0.0  }
 0x4fe   :  { %3208 = vst [vmem:[#allocation16_spill] sm:$0xff] %v2925_v20 }
 0x4ff   :  { %1027 = vmatmul.mubr.f32.vlgmr.msra.gmra.mxu0 %v956_v10  ;;  %1098 = vmatmul.mubr.f32.vlgmr.msra.gmra.mxu1 %v956_v10  ;;  %v2932_v10 = vld [vmem:[%s3046_s1 + $0x10] sm:$0xff] }
 0x500   :  { %1138 = vmatpush1.msra.mxu0 %v2478_v0  ;;  %1209 = vmatpush1.msra.mxu1 %v2484_v53  ;;  %3210 = vst [vmem:[#allocation22_spill] sm:$0xff] %v2932_v10 }
 0x501   :  { %1139 = vmatprep.subr.mxu0 %v2490_v56  ;;  %1210 = vmatprep.subr.mxu1 %v2496_v3 }
 0x502   :  { %1140 = vmatpush1.msra.mxu0 %v2502_v59  ;;  %1211 = vmatpush1.msra.mxu1 %v2508_v54 }
 0x503   :  { %1141 = vmatprep.subr.mxu0 %v2514_v52  ;;  %1212 = vmatprep.subr.mxu1 %v2520_v60 }
 0x504   :  { %1142 = vmatpush1.msra.mxu0 %v2526_v48  ;;  %1213 = vmatpush1.msra.mxu1 %v2532_v50 }
 0x505   :  { %1143 = vmatprep.subr.mxu0 %v2538_v1  ;;  %1214 = vmatprep.subr.mxu1 %v2544_v4 }
 0x506   :  { %1144 = vmatpush1.msra.mxu0 %v2550_v6  ;;  %1215 = vmatpush1.msra.mxu1 %v2556_v8 }
 0x507   :  { %1145 = vmatprep.subr.mxu0 %v2562_v11  ;;  %1216 = vmatprep.subr.mxu1 %v2568_v13 }
 0x508   :  { %1146 = vmatpush1.msra.mxu0 %v2574_v21  ;;  %1217 = vmatpush1.msra.mxu1 %v2580_v22 }
 0x509   :  { %1147 = vmatprep.subr.mxu0 %v2586_v23  ;;  %1218 = vmatprep.subr.mxu1 %v2592_v24 }
 0x50a   :  { %1148 = vmatpush1.msra.mxu0 %v2598_v25  ;;  %1219 = vmatpush1.msra.mxu1 %v2604_v26 }
 0x50b   :  { %1149 = vmatprep.subr.mxu0 %v2610_v27  ;;  %1220 = vmatprep.subr.mxu1 %v2616_v28 }
 0x50c   :  { %1150 = vmatpush1.msra.mxu0 %v2622_v29  ;;  %1221 = vmatpush1.msra.mxu1 %v2628_v30 }
 0x50d   :  { %1151 = vmatprep.subr.mxu0 %v2634_v31  ;;  %1222 = vmatprep.subr.mxu1 %v2640_v32 }
 0x50e   :  { %1152 = vmatpush1.msra.mxu0 %v2646_v33  ;;  %1223 = vmatpush1.msra.mxu1 %v2652_v34 }
 0x50f   :  { %1153 = vmatprep.subr.mxu0 %v2658_v35  ;;  %1224 = vmatprep.subr.mxu1 %v2664_v36 }
 0x510   :  { %1154 = vmatpush1.msra.mxu0 %v2670_v37  ;;  %1225 = vmatpush1.msra.mxu1 %v2676_v38 }
 0x511   :  { %1155 = vmatprep.subr.mxu0 %v2682_v39  ;;  %1226 = vmatprep.subr.mxu1 %v2688_v40 }
 0x512   :  { %1156 = vmatpush1.msra.mxu0 %v2694_v41  ;;  %1227 = vmatpush1.msra.mxu1 %v2837_v18 }
 0x513   :  { %1157 = vmatprep.subr.mxu0 %v2701_v42  ;;  %1228 = vmatprep.subr.mxu1 %v2844_v63 }
 0x514   :  { %1158 = vmatpush1.msra.mxu0 %v2708_v43  ;;  %1229 = vmatpush1.msra.mxu1 %v2851_v57 }
 0x515   :  { %1159 = vmatprep.subr.mxu0 %v2715_v45  ;;  %1230 = vmatprep.subr.mxu1 %v2858_v62 }
 0x516   :  { %1160 = vmatpush1.msra.mxu0 %v2722_v47  ;;  %1231 = vmatpush1.msra.mxu1 %v2865_v12 }
 0x517   :  { %1161 = vmatprep.subr.mxu0 %v2729_v49  ;;  %1232 = vmatprep.subr.mxu1 %v2872_v14 }
 0x518   :  { %1162 = vmatpush1.msra.mxu0 %v2736_v51  ;;  %1233 = vmatpush1.msra.mxu1 %v2879_v16 }
 0x519   :  { %1163 = vmatprep.subr.mxu0 %v2743_v44  ;;  %1234 = vmatprep.subr.mxu1 %v2886_v15  ;;  %v1525_v44 = vld [vmem:[%s3047_s0 + $0xb0] sm:$0xff] }
 0x51a   :  { %1164 = vmatpush1.msra.mxu0 %v2750_v2  ;;  %1235 = vmatpush1.msra.mxu1 %v2893_v17 }
 0x51b   :  { %1165 = vmatprep.subr.mxu0 %v2757_v5  ;;  %1236 = vmatprep.subr.mxu1 %v2900_v19 }
 0x51c   :  { %1166 = vmatpush1.msra.mxu0 %v3204_v46  ;;  %1237 = vmatpush1.msra.mxu1 %v2907_v61  ;;  %v1523_v61 = vld [vmem:[%s3047_s0 + $0xa0] sm:$0xff]  ;;  %v1524_v46 = vld [vmem:[%s3047_s0 + $0xa8] sm:$0xff] }
 0x51d   :  { %1167 = vmatprep.subr.mxu0 %v2913_v58  ;;  %1238 = vmatprep.subr.mxu1 %v2919_v9  ;;  %v3211_v58 = vld [vmem:[#allocation11_spill] sm:$0xff]  ;;  %v3212_v9 = vld [vmem:[#allocation17_spill] sm:$0xff] }
 0x51e   :  { %1168 = vmatpush1.msra.mxu0 %v2925_v20  ;;  %1201 = vmatprep.mubr.f32.mxu0 %v3209_v55 }
 0x51f   :  { %1239 = vmatpush1.msra.mxu1 %v2932_v10  ;;  %1272 = vmatprep.mubr.f32.mxu1 %v3209_v55 }
 0x520   :  { %1312 = vmatprep.subr.mxu0 %v3211_v58  ;;  %1383 = vmatprep.subr.mxu1 %v3212_v9  ;;  %v1526_v58 = vld [vmem:[%s3047_s0 + $0xb8] sm:$0xff] }
 0x5bf   :  { %v1028_v20 = vpop.f32.mrf.mxu0  ;;  %v1099_v10 = vpop.f32.mrf.mxu1 }
 0x5c0   :  { %v1104_v19 = vadd.f32 %v1523_v61, %v1028_v20  ;;  %v1106_v61 = vadd.f32 %v1525_v44, %v1099_v10  ;;  %v1538_v10 = vld [vmem:[%s3047_s0 + $0xe8] sm:$0xff] }
 0x5c1   :  { %v1030_v5 = vpop.f32.mrf.mxu0  ;;  %v1101_v9 = vpop.f32.mrf.mxu1 }
 0x5c2   :  { %v1527_v17 = vmul.f32 -1.442695, %v1104_v19  ;;  %v1105_v2 = vadd.f32 %v1524_v46, %v1030_v5  ;;  %v1107_v15 = vadd.f32 %v1526_v58, %v1101_v9 }
 0x5c4   :  { %1625 = vpow2.f32 %v1527_v17  ;;  %v1528_v55 = vmul.f32 -1.442695, %v1105_v2  ;;  %v1529_v16 = vmul.f32 -1.442695, %v1107_v15 }
 0x5c6   :  { %1627 = vpow2.f32 %v1528_v55 }
 0x5c7   :  { %1629 = vpow2.f32 %v1529_v16 }
 0x5d1   :  { %v1626_v51 = vpop.eup %1625 }
 0x5d2   :  { %v1111_v20 = vadd.f32 1.0, %v1626_v51 }
 0x5d3   :  { %v1628_v19 = vpop.eup %1627 }
 0x5d4   :  { %1631 = vrcp.f32 %v1111_v20  ;;  %v1117_v5 = vadd.f32 1.0, %v1628_v19  ;;  %v1630_v2 = vpop.eup %1629 }
 0x5d5   :  { %1633 = vtanh.f32 %v1106_v61  ;;  %v1124_v14 = vadd.f32 1.0, %v1630_v2 }
 0x5d6   :  { %1635 = vrcp.f32 %v1117_v5 }
 0x5d7   :  { %1637 = vrcp.f32 %v1124_v14  ;;  %v1537_v14 = vld [vmem:[%s3047_s0 + $0xe0] sm:$0xff] }
 0x5e1   :  { %v1632_v17 = vpop.eup %1631 }
 0x5e2   :  { %v1634_v46 = vpop.eup %1633 }
 0x5e3   :  { %v1636_v55 = vpop.eup %1635  ;;  %v1128_v58 = vmul.f32 %v1634_v46, %v1632_v17  ;;  %v1540_v17 = vld [vmem:[%s3047_s0 + $0xf8] sm:$0xff] }
 0x5e4   :  { %v1127_v9 = vmul.f32 %v1636_v55, %v2794_v7  ;;  %v1638_v51 = vpop.eup %1637 }
 0x5e6   :  { %v2951_v49 = vadd.f32 %v1128_v58, %v1127_v9  ;;  %v1539_v58 = vld [vmem:[%s3047_s0 + $0xf0] sm:$0xff] }
 0x5e8   :  { %1639 = vtanh.f32 %v2951_v49 }
 0x5f5   :  { %v1640_v44 = vpop.eup %1639 }
 0x5f6   :  { %v1131_v16 = vmul.f32 %v1640_v44, %v1638_v51 }
 0x5f8   :  { %1202 = vmatmul.mubr.f32.vlgmr.msra.gmra.mxu0 %v1131_v16  ;;  %1273 = vmatmul.mubr.f32.vlgmr.msra.gmra.mxu1 %v1131_v16 }
 0x5f9   :  { %1313 = vmatpush1.msra.mxu0 %v2478_v0  ;;  %1384 = vmatpush1.msra.mxu1 %v2484_v53  ;;  %v3213_v0 = vld [vmem:[#allocation4_spill] sm:$0xff]  ;;  %v3214_v53 = vld [vmem:[#allocation9_spill] sm:$0xff] }
 0x5fa   :  { %1314 = vmatprep.subr.mxu0 %v2490_v56  ;;  %1385 = vmatprep.subr.mxu1 %v2496_v3  ;;  %v3215_v56 = vld [vmem:[#allocation6_spill] sm:$0xff] }
 0x5fb   :  { %1315 = vmatpush1.msra.mxu0 %v2502_v59  ;;  %1386 = vmatpush1.msra.mxu1 %v2508_v54  ;;  %v3216_v3 = vld [vmem:[#allocation18_spill] sm:$0xff]  ;;  %v3217_v59 = vld [vmem:[#allocation13_spill] sm:$0xff] }
 0x5fc   :  { %1316 = vmatprep.subr.mxu0 %v2514_v52  ;;  %1387 = vmatprep.subr.mxu1 %v2520_v60  ;;  %v3218_v54 = vld [vmem:[#allocation10_spill] sm:$0xff]  ;;  %v3219_v52 = vld [vmem:[#allocation7_spill] sm:$0xff] }
 0x5fd   :  { %1317 = vmatpush1.msra.mxu0 %v2526_v48  ;;  %1388 = vmatpush1.msra.mxu1 %v2532_v50  ;;  %v3220_v60 = vld [vmem:[#allocation19_spill] sm:$0xff]  ;;  %v3222_v50 = vld [vmem:[#allocation12_spill] sm:$0xff] }
 0x5fe   :  { %1318 = vmatprep.subr.mxu0 %v2538_v1  ;;  %1389 = vmatprep.subr.mxu1 %v2544_v4  ;;  %v3221_v48 = vld [vmem:[#allocation15_spill] sm:$0xff]  ;;  %v3223_v1 = vld [vmem:[#allocation8_spill] sm:$0xff] }
 0x5ff   :  { %1319 = vmatpush1.msra.mxu0 %v2550_v6  ;;  %1390 = vmatpush1.msra.mxu1 %v2556_v8  ;;  %v3224_v4 = vld [vmem:[#allocation20_spill] sm:$0xff]  ;;  %v3225_v6 = vld [vmem:[#allocation14_spill] sm:$0xff]  ;;  %v3226_v8 = vld [vmem:[#allocation21_spill] sm:$0xff] }
 0x600   :  { %1320 = vmatprep.subr.mxu0 %v2562_v11  ;;  %1391 = vmatprep.subr.mxu1 %v2568_v13  ;;  %v3227_v11 = vld [vmem:[#allocation16_spill] sm:$0xff]  ;;  %v3228_v13 = vmov 0.0  }
 0x601   :  { %1321 = vmatpush1.msra.mxu0 %v2574_v21  ;;  %1392 = vmatpush1.msra.mxu1 %v2580_v22  ;;  %v3229_v21 = vld [vmem:[#allocation22_spill] sm:$0xff]  ;;  %v1530_v22 = vld [vmem:[%s3047_s0 + $0xc0] sm:$0xff] }
 0x602   :  { %1322 = vmatprep.subr.mxu0 %v2586_v23  ;;  %1393 = vmatprep.subr.mxu1 %v2592_v24  ;;  %v1531_v24 = vld [vmem:[%s3047_s0 + $0xc8] sm:$0xff] }
 0x603   :  { %1323 = vmatpush1.msra.mxu0 %v2598_v25  ;;  %1394 = vmatpush1.msra.mxu1 %v2604_v26 }
 0x604   :  { %1324 = vmatprep.subr.mxu0 %v2610_v27  ;;  %1395 = vmatprep.subr.mxu1 %v2616_v28 }
 0x605   :  { %1325 = vmatpush1.msra.mxu0 %v2622_v29  ;;  %1396 = vmatpush1.msra.mxu1 %v2628_v30 }
 0x606   :  { %1326 = vmatprep.subr.mxu0 %v2634_v31  ;;  %1397 = vmatprep.subr.mxu1 %v2640_v32  ;;  %v1533_v31 = vld [vmem:[%s3047_s0 + $0xd8] sm:$0xff] }
 0x607   :  { %1327 = vmatpush1.msra.mxu0 %v2646_v33  ;;  %1398 = vmatpush1.msra.mxu1 %v2652_v34  ;;  %v1532_v34 = vld [vmem:[%s3047_s0 + $0xd0] sm:$0xff] }
 0x608   :  { %1328 = vmatprep.subr.mxu0 %v2658_v35  ;;  %1399 = vmatprep.subr.mxu1 %v2664_v36 }
 0x609   :  { %1329 = vmatpush1.msra.mxu0 %v2670_v37  ;;  %1400 = vmatpush1.msra.mxu1 %v2676_v38 }
 0x60a   :  { %1330 = vmatprep.subr.mxu0 %v2682_v39  ;;  %1401 = vmatprep.subr.mxu1 %v2688_v40 }
 0x60b   :  { %1331 = vmatpush1.msra.mxu0 %v2694_v41  ;;  %1402 = vmatpush1.msra.mxu1 %v2837_v18 }
 0x60c   :  { %1332 = vmatprep.subr.mxu0 %v2701_v42  ;;  %1403 = vmatprep.subr.mxu1 %v2844_v63 }
 0x60d   :  { %1333 = vmatpush1.msra.mxu0 %v2708_v43  ;;  %1404 = vmatpush1.msra.mxu1 %v2851_v57 }
 0x60e   :  { %1334 = vmatprep.subr.mxu0 %v2715_v45  ;;  %1405 = vmatprep.subr.mxu1 %v2858_v62 }
 0x60f   :  { %1335 = vmatpush1.msra.mxu0 %v2722_v47  ;;  %1406 = vmatpush1.msra.mxu1 %v2865_v12 }
 0x610   :  { %1336 = vmatprep.subr.mxu0 %v3213_v0  ;;  %1407 = vmatprep.subr.mxu1 %v3214_v53 }
 0x611   :  { %1337 = vmatpush1.msra.mxu0 %v3215_v56  ;;  %1408 = vmatpush1.msra.mxu1 %v3216_v3 }
 0x612   :  { %1338 = vmatprep.subr.mxu0 %v3217_v59  ;;  %1409 = vmatprep.subr.mxu1 %v3218_v54 }
 0x613   :  { %1339 = vmatpush1.msra.mxu0 %v3219_v52  ;;  %1410 = vmatpush1.msra.mxu1 %v3220_v60 }
 0x614   :  { %1340 = vmatprep.subr.mxu0 %v3221_v48  ;;  %1411 = vmatprep.subr.mxu1 %v3222_v50 }
 0x615   :  { %1341 = vmatpush1.msra.mxu0 %v3223_v1  ;;  %1412 = vmatpush1.msra.mxu1 %v3224_v4 }
 0x616   :  { %1342 = vmatprep.subr.mxu0 %v3225_v6  ;;  %1413 = vmatprep.subr.mxu1 %v3226_v8 }
 0x617   :  { %1343 = vmatpush1.msra.mxu0 %v3227_v11  ;;  %1376 = vmatprep.mubr.f32.mxu0 %v3228_v13 }
 0x618   :  { %1414 = vmatpush1.msra.mxu1 %v3229_v21  ;;  %1447 = vmatprep.mubr.f32.mxu1 %v3228_v13 }
 0x6b8   :  { %v1203_v23 = vpop.f32.mrf.mxu0  ;;  %v1274_v29 = vpop.f32.mrf.mxu1 }
 0x6b9   :  { %v1279_v25 = vadd.f32 %v1530_v22, %v1203_v23  ;;  %v1281_v37 = vadd.f32 %v1532_v34, %v1274_v29 }
 0x6ba   :  { %v1205_v26 = vpop.f32.mrf.mxu0  ;;  %v1276_v32 = vpop.f32.mrf.mxu1 }
 0x6bb   :  { %v1534_v27 = vmul.f32 -1.442695, %v1279_v25  ;;  %v1280_v28 = vadd.f32 %v1531_v24, %v1205_v26  ;;  %v1282_v33 = vadd.f32 %v1533_v31, %v1276_v32 }
 0x6bd   :  { %1641 = vpow2.f32 %v1534_v27  ;;  %v1535_v30 = vmul.f32 -1.442695, %v1280_v28  ;;  %v1536_v35 = vmul.f32 -1.442695, %v1282_v33 }
 0x6bf   :  { %1643 = vpow2.f32 %v1535_v30 }
 0x6c0   :  { %1645 = vpow2.f32 %v1536_v35 }
 0x6ca   :  { %v1642_v36 = vpop.eup %1641 }
 0x6cb   :  { %v1286_v38 = vadd.f32 1.0, %v1642_v36 }
 0x6cc   :  { %v1644_v39 = vpop.eup %1643 }
 0x6cd   :  { %1647 = vrcp.f32 %v1286_v38  ;;  %v1292_v40 = vadd.f32 1.0, %v1644_v39  ;;  %v1646_v41 = vpop.eup %1645 }
 0x6ce   :  { %1649 = vtanh.f32 %v1281_v37  ;;  %v1299_v47 = vadd.f32 1.0, %v1646_v41 }
 0x6cf   :  { %1651 = vrcp.f32 %v1292_v40 }
 0x6d0   :  { %1653 = vrcp.f32 %v1299_v47 }
 0x6da   :  { %v1648_v42 = vpop.eup %1647 }
 0x6db   :  { %v1650_v43 = vpop.eup %1649 }
 0x6dc   :  { %v1652_v45 = vpop.eup %1651  ;;  %v1303_v7 = vmul.f32 %v1650_v43, %v1648_v42 }
 0x6dd   :  { %v1302_v18 = vmul.f32 %v1652_v45, %v2951_v49  ;;  %v1654_v57 = vpop.eup %1653 }
 0x6df   :  { %v1304_v63 = vadd.f32 %v1303_v7, %v1302_v18 }
 0x6e1   :  { %1655 = vtanh.f32 %v1304_v63 }
 0x6ee   :  { %v1656_v62 = vpop.eup %1655 }
 0x6ef   :  { %v1306_v12 = vmul.f32 %v1656_v62, %v1654_v57 }
 0x6f1   :  { %1377 = vmatmul.mubr.f32.vlgmr.msra.gmra.mxu0 %v1306_v12  ;;  %1448 = vmatmul.mubr.f32.vlgmr.msra.gmra.mxu1 %v1306_v12 }
 0x7b1   :  { %v1378_v15 = vpop.f32.mrf.mxu0  ;;  %v1449_v5 = vpop.f32.mrf.mxu1 }
 0x7b2   :  { %v1454_v61 = vadd.f32 %v1537_v14, %v1378_v15  ;;  %v1456_v44 = vadd.f32 %v1539_v58, %v1449_v5 }
 0x7b3   :  { %v1380_v20 = vpop.f32.mrf.mxu0  ;;  %v1451_v46 = vpop.f32.mrf.mxu1 }
 0x7b4   :  { %v1541_v49 = vmul.f32 -1.442695, %v1454_v61  ;;  %v1455_v19 = vadd.f32 %v1538_v10, %v1380_v20  ;;  %v1457_v55 = vadd.f32 %v1540_v17, %v1451_v46 }
 0x7b6   :  { %1657 = vpow2.f32 %v1541_v49  ;;  %v1542_v2 = vmul.f32 -1.442695, %v1455_v19  ;;  %v1543_v9 = vmul.f32 -1.442695, %v1457_v55 }
 0x7b8   :  { %1659 = vpow2.f32 %v1542_v2 }
 0x7b9   :  { %1661 = vpow2.f32 %v1543_v9 }
 0x7c3   :  { %v1658_v51 = vpop.eup %1657 }
 0x7c4   :  { %v1461_v16 = vadd.f32 1.0, %v1658_v51 }
 0x7c5   :  { %v1660_v0 = vpop.eup %1659 }
 0x7c6   :  { %1663 = vrcp.f32 %v1461_v16  ;;  %v1467_v53 = vadd.f32 1.0, %v1660_v0  ;;  %v1662_v56 = vpop.eup %1661 }
 0x7c7   :  { %1665 = vtanh.f32 %v1456_v44  ;;  %v1474_v52 = vadd.f32 1.0, %v1662_v56 }
 0x7c8   :  { %1667 = vrcp.f32 %v1467_v53 }
 0x7c9   :  { %1669 = vrcp.f32 %v1474_v52 }
 0x7d3   :  { %v1664_v3 = vpop.eup %1663 }
 0x7d4   :  { %v1666_v59 = vpop.eup %1665 }
 0x7d5   :  { %v1668_v54 = vpop.eup %1667  ;;  %v1478_v60 = vmul.f32 %v1666_v59, %v1664_v3 }
 0x7d6   :  { %v1477_v48 = vmul.f32 %v1668_v54, %v1304_v63  ;;  %v1670_v1 = vpop.eup %1669 }
 0x7d8   :  { %v1479_v50 = vadd.f32 %v1478_v60, %v1477_v48 }
 0x7da   :  { %1671 = vtanh.f32 %v1479_v50 }
 0x7e7   :  { %v1672_v4 = vpop.eup %1671 }
 0x7e8   :  { %v1481_v6 = vmul.f32 %v1672_v4, %v1670_v1 }
 0x7ea   :  { %1487 = vst [vmem:[%s3048_s2] sm:$0xff] %v1481_v6 }

</bundles_post_ra>
